<compile_context>
chip_gen: v7x
topology: tpu7x:2x2x1
jax: 0.10.0
libtpu: 0.0.40
codegen_flags: <defaults>
</compile_context>

<pallas_src>
import jax
import jax.numpy as jnp
from jax import lax
from jax.experimental import pallas as pl
from jax.experimental.pallas import tpu as pltpu


# --------------------------------------------------------------------------
# Fused kernel body factory
# --------------------------------------------------------------------------
def _make_fused_kernel(*, nplanes, wq, tout, wout, cmid, has_expand,
                       has_residual, tap_table, compute_dtype):
    """expand(1x1) -> depthwise(3x3) -> project(1x1), fully fused in VMEM."""
    f32 = jnp.float32

    # Group the 9 depthwise taps by kernel row (kh): one slab load per
    # (kh, plane) per output row, sliced in registers for the kw offsets.
    kh_groups = []
    for kh in range(3):
        taps = [(t, tap_table[t]) for t in range(3 * kh, 3 * kh + 3)]
        ro = taps[0][1][1]
        assert all(tt[1][1] == ro for tt in taps)
        plane_ids = []
        for _, (pidx, _, _) in taps:
            if pidx not in plane_ids:
                plane_ids.append(pidx)
        kh_groups.append((ro, plane_ids, taps))

    def kernel(*refs):
        refs = list(refs)
        x_planes = [refs.pop(0) for _ in range(nplanes)]
        w_e_ref = refs.pop(0) if has_expand else None
        w_dw_ref = refs.pop(0)
        b_dw_ref = refs.pop(0)
        w_p_ref = refs.pop(0)
        b_p_ref = refs.pop(0)
        r_ref = refs.pop(0) if has_residual else None
        o_ref = refs.pop(0)
        h_planes = [refs.pop(0) for _ in range(nplanes)] if has_expand else []
        dw_ref = refs.pop(0)

        # ---- stage 1: 1x1 expand + BN + ReLU6 — ONE matmul per plane --------
        if has_expand:
            we = w_e_ref[...]                        # (Cin+1, Cmid), BN folded
            for pidx in range(nplanes):
                xf = x_planes[pidx][...]             # (tin*wq, Cin+1)
                y = jnp.dot(xf, we, preferred_element_type=f32)
                # Spatial zero-padding rows/cols have the appended ones-channel
                # == 0, so the folded bias contributes nothing there and
                # ReLU6(0) == 0 — exactly the zero-padded expanded activation
                # the depthwise conv expects (no mask input / multiply needed).
                h_planes[pidx][...] = jnp.clip(y, 0.0, 6.0).astype(compute_dtype)

            def load_row(pidx, row):                 # -> (wq, Cmid) f32
                return h_planes[pidx][pl.ds(row * wq, wq), :].astype(f32)
        else:
            def load_row(pidx, row):                 # -> (wq, Cmid) f32
                return x_planes[pidx][pl.ds(row * wq, wq), :].astype(f32)

        w_dw = w_dw_ref[...].astype(f32)             # (9, 1, Cmid), BN folded
        b_dw = b_dw_ref[...].astype(f32)             # (1, Cmid)

        # ---- stage 2: 3x3 depthwise + BN + ReLU6, one output row at a time --
        # (bounded accumulator live range; staged into flat VMEM scratch)
        @pl.loop(0, tout)
        def _(y):
            acc = jnp.zeros((wout, cmid), f32)
            for ro, plane_ids, taps in kh_groups:
                slabs = {pidx: load_row(pidx, ro + y) for pidx in plane_ids}
                for t, (pidx, _, co) in taps:
                    acc = acc + slabs[pidx][co:co + wout] * w_dw[t]
            h_row = jnp.clip(acc + b_dw, 0.0, 6.0).astype(compute_dtype)
            dw_ref[pl.ds(y * wout, wout), :] = h_row

        # ---- stage 3: 1x1 project + BN (+ residual) — ONE merged matmul -----
        out = jnp.dot(dw_ref[...], w_p_ref[...], preferred_element_type=f32)
        out = out + b_p_ref[...].astype(f32)
        if has_residual:
            out = out + r_ref[...].astype(f32)
        o_ref[...] = out.astype(o_ref.dtype)

    return kernel


# --------------------------------------------------------------------------
# Wrapper: BN folding, halo row-block gather, stride-2 parity split, pallas_call
# --------------------------------------------------------------------------
def inverted_residual_forward(p, x_nchw, *, row_tile=None,
                              compute_dtype=jnp.float32,
                              lane_pad_output=None):
    x = jnp.transpose(x_nchw, (0, 2, 3, 1)).astype(jnp.float32)   # NCHW -> NHWC
    N, H, W, Cin = x.shape
    s = p["stride"]
    has_expand = p["expand_ratio"] != 1
    identity = p["identity"]

    Cmid = p["w_dw"].shape[-1]
    Cout = p["w_proj"].shape[1]
    Hout = (H - 1) // s + 1
    Wout = (W - 1) // s + 1
    Hp, Wp = H + 2, W + 2

    # Bigger row tiles: whole feature map per grid step for CRNN/MobileNet-sized
    # inputs (per-step overhead ~0.35us; small tiles waste HBM bandwidth).
    if row_tile is None:
        row_tile = 32
    tout = min(row_tile, Hout)
    R = (Hout + tout - 1) // tout
    hout_pad = R * tout

    # Lane-dense output store: pad Cout up to a multiple of 128 only when the
    # HBM write amplification is modest (always correct; sliced after the call).
    if lane_pad_output is None:
        lane_pad_output = (Cout % 128 != 0) and (Cout >= 64)
    Cout_p = ((Cout + 127) // 128) * 128 if lane_pad_output else Cout

    # ---- fold BN scale/bias into conv weights (one-time, host side) ---------
    if has_expand:
        # bias folded via the appended ones-channel (last input row of w_e).
        w_e = jnp.concatenate(
            [p["w_expand"] * p["s_expand"][None, :], p["b_expand"][None, :]],
            axis=0).astype(compute_dtype)                       # (Cin+1, Cmid)
    w_dw = (p["w_dw"] * p["s_dw"]).reshape(9, 1, Cmid).astype(jnp.float32)
    b_dw = p["b_dw"].reshape(1, Cmid).astype(jnp.float32)
    w_p = (p["w_proj"] * p["s_proj"][None, :]).astype(compute_dtype)
    b_p = p["b_proj"].reshape(1, Cout).astype(jnp.float32)
    if Cout_p != Cout:
        w_p = jnp.pad(w_p, ((0, 0), (0, Cout_p - Cout)))
        b_p = jnp.pad(b_p, ((0, 0), (0, Cout_p - Cout)))

    # ---- spatial prep: (ones-channel), zero-pad, halo row-block gather; for
    #      stride 2: even/odd column planes + row-parity gather so every
    #      depthwise tap is a contiguous slice (native stride-2, no over-compute)
    x_src = x
    if has_expand:
        x_src = jnp.concatenate([x, jnp.ones((N, H, W, 1), jnp.float32)], -1)
    xp = jnp.pad(x_src.astype(compute_dtype), ((0, 0), (1, 1), (1, 1), (0, 0)))
    Cx = xp.shape[-1]

    if s == 1:
        tin, wq = tout + 2, Wp
        base = jnp.arange(R) * tout
        idx = jnp.clip(base[:, None] + jnp.arange(tin)[None, :], 0, Hp - 1)
        plane_srcs = [xp]
        tap_table = [(0, kh, kw) for kh in range(3) for kw in range(3)]
    else:
        tin, wq = 2 * tout + 1, Wout + 1
        base = jnp.arange(R) * (2 * tout)
        rows_ev = base[:, None] + 2 * jnp.arange(tout + 1)[None, :]
        rows_od = base[:, None] + 1 + 2 * jnp.arange(tout)[None, :]
        idx = jnp.clip(jnp.concatenate([rows_ev, rows_od], axis=1), 0, Hp - 1)
        col_sets = [jnp.clip(2 * jnp.arange(wq), 0, Wp - 1),
                    jnp.clip(2 * jnp.arange(wq) + 1, 0, Wp - 1)]
        plane_srcs = [xp[:, :, cs, :] for cs in col_sets]
        ro_tab = (0, tout + 1, 1)   # kh -> gathered row offset (evens, then odds)
        pl_tab = (0, 1, 0)          # kw -> plane (even / odd columns)
        co_tab = (0, 0, 1)          # kw -> column offset within the plane
        tap_table = [(pl_tab[kw], ro_tab[kh], co_tab[kw])
                     for kh in range(3) for kw in range(3)]

    nplanes = len(plane_srcs)
    # flatten (tin, wq) -> tin*wq so the expand matmul needs no in-kernel reshape
    planes = [src[:, idx].reshape(N * R, tin * wq, Cx) for src in plane_srcs]

    if identity:
        res = x
        if hout_pad > Hout:
            res = jnp.pad(res, ((0, 0), (0, hout_pad - Hout), (0, 0), (0, 0)))
        if Cout_p != Cout:
            res = jnp.pad(res, ((0, 0), (0, 0), (0, 0), (0, Cout_p - Cout)))
        res = res.reshape(N * R, tout * Wout, Cout_p)

    # ---- assemble pallas_call ------------------------------------------------
    inputs, in_specs = [], []
    for arr in planes:
        inputs.append(arr)
        in_specs.append(pl.BlockSpec((None, tin * wq, Cx),
                                     lambda n, r: (n * R + r, 0, 0)))
    if has_expand:
        inputs.append(w_e)
        in_specs.append(pl.BlockSpec((Cin + 1, Cmid), lambda n, r: (0, 0)))
    inputs += [w_dw, b_dw, w_p, b_p]
    in_specs += [pl.BlockSpec((9, 1, Cmid), lambda n, r: (0, 0, 0)),
                 pl.BlockSpec((1, Cmid), lambda n, r: (0, 0)),
                 pl.BlockSpec((Cmid, Cout_p), lambda n, r: (0, 0)),
                 pl.BlockSpec((1, Cout_p), lambda n, r: (0, 0))]
    if identity:
        inputs.append(res)
        in_specs.append(pl.BlockSpec((None, tout * Wout, Cout_p),
                                     lambda n, r: (n * R + r, 0, 0)))

    itemsize = jnp.dtype(compute_dtype).itemsize
    scratch = []
    if has_expand:
        scratch += [pltpu.VMEM((tin * wq, Cmid), compute_dtype)
                    for _ in range(nplanes)]
    scratch.append(pltpu.VMEM((tout * Wout, Cmid), compute_dtype))

    # VMEM budget: double-buffered inputs/outputs + persistent scratch; clamp to
    # [32 MiB, 48 MiB] so bigger tiles are allowed but v7x (64 MiB) keeps headroom.
    est = (2 * nplanes * tin * wq * Cx * itemsize
           + (nplanes * tin * wq + tout * Wout) * Cmid * itemsize
           + 2 * ((Cin + 1) * Cmid + Cmid * Cout_p) * itemsize
           + 2 * (10 * Cmid + Cout_p) * 4
           + 2 * tout * Wout * Cout_p * 4 * (2 if identity else 1))
    vmem_limit = int(min(max(2 * est, 32 << 20), 48 << 20))

    kernel = _make_fused_kernel(
        nplanes=nplanes, wq=wq, tout=tout, wout=Wout, cmid=Cmid,
        has_expand=has_expand, has_residual=identity,
        tap_table=tap_table, compute_dtype=compute_dtype)

    out = pl.pallas_call(
        kernel,
        out_shape=jax.ShapeDtypeStruct((N * R, tout * Wout, Cout_p), x.dtype),
        grid=(N, R),
        in_specs=in_specs,
        out_specs=pl.BlockSpec((None, tout * Wout, Cout_p),
                               lambda n, r: (n * R + r, 0, 0)),
        scratch_shapes=scratch,
        compiler_params=pltpu.CompilerParams(
            dimension_semantics=("parallel", "parallel"),
            vmem_limit_bytes=vmem_limit),
    )(*inputs)

    out = out.reshape(N, hout_pad, Wout, Cout_p)[:, :Hout, :, :Cout]
    return jnp.transpose(out, (0, 3, 1, 2))       # NHWC -> NCHW


# --------------------------------------------------------------------------
# Parameter construction (deterministic, synthetic)
# --------------------------------------------------------------------------
def _fold_bn(gamma, beta, mean, var, eps=1e-5):
    scale = gamma / jnp.sqrt(var + eps)
    bias = beta - mean * scale
    return scale, bias


def init_inverted_residual(key, inplanes, outplanes, stride, expand_ratio):
    assert stride in (1, 2)
    hidplanes = int(round(inplanes * expand_ratio))
    keys = jax.random.split(key, 12)
    p = {
        "inplanes": inplanes,
        "outplanes": outplanes,
        "stride": stride,
        "expand_ratio": expand_ratio,
        "identity": (stride == 1 and inplanes == outplanes),
    }

    def bn_params(k, c):
        k1, k2, k3, k4 = jax.random.split(k, 4)
        gamma = jax.random.uniform(k1, (c,), jnp.float32, 0.5, 1.5)
        beta = 0.1 * jax.random.normal(k2, (c,), jnp.float32)
        mean = 0.1 * jax.random.normal(k3, (c,), jnp.float32)
        var = jax.random.uniform(k4, (c,), jnp.float32, 0.5, 1.5)
        return _fold_bn(gamma, beta, mean, var)

    if expand_ratio != 1:
        p["w_expand"] = 0.2 * jax.random.normal(
            keys[0], (inplanes, hidplanes), jnp.float32)     # 1x1, [Cin, Cmid]
        p["s_expand"], p["b_expand"] = bn_params(keys[1], hidplanes)

    p["w_dw"] = 0.2 * jax.random.normal(keys[2], (3, 3, hidplanes), jnp.float32)
    p["s_dw"], p["b_dw"] = bn_params(keys[3], hidplanes)

    p["w_proj"] = 0.2 * jax.random.normal(
        keys[4], (hidplanes, outplanes), jnp.float32)        # 1x1, [Cmid, Cout]
    p["s_proj"], p["b_proj"] = bn_params(keys[5], outplanes)
    return p


# --------------------------------------------------------------------------
# Pure-JAX reference (lax convolutions) for validation
# --------------------------------------------------------------------------
def reference_forward(p, x_nchw):
    dn = ("NHWC", "HWIO", "NHWC")
    prec = lax.Precision.HIGHEST
    x = jnp.transpose(x_nchw, (0, 2, 3, 1))
    h = x
    if p["expand_ratio"] != 1:
        h = lax.conv_general_dilated(h, p["w_expand"][None, None], (1, 1), "VALID",
                                     dimension_numbers=dn, precision=prec)
        h = jnp.clip(h * p["s_expand"] + p["b_expand"], 0.0, 6.0)
    C = h.shape[-1]
    h = lax.conv_general_dilated(h, p["w_dw"].reshape(3, 3, 1, C),
                                 (p["stride"],) * 2, ((1, 1), (1, 1)),
                                 dimension_numbers=dn, feature_group_count=C,
                                 precision=prec)
    h = jnp.clip(h * p["s_dw"] + p["b_dw"], 0.0, 6.0)
    h = lax.conv_general_dilated(h, p["w_proj"][None, None], (1, 1), "VALID",
                                 dimension_numbers=dn, precision=prec)
    h = h * p["s_proj"] + p["b_proj"]
    if p["identity"]:
        h = h + x
    return jnp.transpose(h, (0, 3, 1, 2))


if __name__ == "__main__":
    key = jax.random.PRNGKey(0)
    kx, kp1, kp2, kp3, kp4, kx3 = jax.random.split(key, 6)

    x = jax.random.normal(kx, (2, 4, 16, 16), jnp.float32)    # NCHW

    # Config 1: expand 4, stride 1, identity residual (single-block row tile).
    p1 = init_inverted_residual(kp1, inplanes=4, outplanes=4,
                                stride=1, expand_ratio=4)
    out1 = jax.block_until_ready(inverted_residual_forward(p1, x))
    ref1 = reference_forward(p1, x)
    assert out1.shape == (2, 4, 16, 16)
    assert jnp.allclose(out1, ref1, atol=1e-2, rtol=1e-2)

    # Config 2: expand 1 (no expand conv), stride 2, no residual.
    p2 = init_inverted_residual(kp2, inplanes=4, outplanes=8,
                                stride=2, expand_ratio=1)
    out2 = jax.block_until_ready(inverted_residual_forward(p2, x))
    ref2 = reference_forward(p2, x)
    assert out2.shape == (2, 8, 8, 8)
    assert jnp.allclose(out2, ref2, atol=1e-2, rtol=1e-2)

    # Config 3: expand 6, stride 2, Hout=10 with row_tile=8: exercises multiple
    # row blocks per image and the clipped tail block.
    x3 = jax.random.normal(kx3, (2, 4, 20, 20), jnp.float32)
    p3 = init_inverted_residual(kp3, inplanes=4, outplanes=8,
                                stride=2, expand_ratio=6)
    out3 = jax.block_until_ready(inverted_residual_forward(p3, x3, row_tile=8))
    ref3 = reference_forward(p3, x3)
    assert out3.shape == (2, 8, 10, 10)
    assert jnp.allclose(out3, ref3, atol=1e-2, rtol=1e-2)

    # Config 4: expand 1, stride 1, identity (no-expand path + residual).
    p4 = init_inverted_residual(kp4, inplanes=4, outplanes=4,
                                stride=1, expand_ratio=1)
    out4 = jax.block_until_ready(inverted_residual_forward(p4, x))
    ref4 = reference_forward(p4, x)
    assert jnp.allclose(out4, ref4, atol=1e-2, rtol=1e-2)

    # Lane-dense output path (Cout padded to 128 in the wrapper, sliced after).
    out1_pad = jax.block_until_ready(
        inverted_residual_forward(p1, x, lane_pad_output=True))
    assert jnp.allclose(out1_pad, ref1, atol=1e-2, rtol=1e-2)

    # bf16 compute path (v6e/v7x HBM-traffic optimization): f32 accumulation,
    # activations quantized to bf16 between stages -> looser tolerance.
    out1_bf16 = jax.block_until_ready(
        inverted_residual_forward(p1, x, compute_dtype=jnp.bfloat16))
    assert jnp.allclose(out1_bf16, ref1, atol=2e-1, rtol=1e-1)

    print("KERNEL_OK")
</pallas_src>

<mosaic_0001>
module attributes {stable_mosaic.version = 11 : i64} {
  func.func @kernel(%arg0: i32, %arg1: i32, %arg2: memref<1x324x5xf32, #tpu.memory_space<vmem>>, %arg3: memref<5x16xf32, #tpu.memory_space<vmem>>, %arg4: memref<9x1x16xf32, #tpu.memory_space<vmem>>, %arg5: memref<1x16xf32, #tpu.memory_space<vmem>>, %arg6: memref<16x4xf32, #tpu.memory_space<vmem>>, %arg7: memref<1x4xf32, #tpu.memory_space<vmem>>, %arg8: memref<1x256x4xf32, #tpu.memory_space<vmem>>, %arg9: memref<1x256x4xf32, #tpu.memory_space<vmem>>, %arg10: memref<324x16xf32, #tpu.memory_space<vmem>>, %arg11: memref<256x16xf32, #tpu.memory_space<vmem>>) attributes {dimension_semantics = [#tpu.dimension_semantics<parallel>, #tpu.dimension_semantics<parallel>], iteration_bounds = array<i64: 2, 1>, scalar_prefetch = 0 : i64, scratch_operands = 2 : i64, tpu.core_type = #tpu.core_type<tc>, window_params = [{transform_indices = @transform_0, window_bounds = array<i64: 1, 324, 5>}, {pipeline_mode = #tpu.pipeline_mode<synchronous>, transform_indices = @transform_1, window_bounds = array<i64: 5, 16>}, {pipeline_mode = #tpu.pipeline_mode<synchronous>, transform_indices = @transform_2, window_bounds = array<i64: 9, 1, 16>}, {pipeline_mode = #tpu.pipeline_mode<synchronous>, transform_indices = @transform_3, window_bounds = array<i64: 1, 16>}, {pipeline_mode = #tpu.pipeline_mode<synchronous>, transform_indices = @transform_4, window_bounds = array<i64: 16, 4>}, {pipeline_mode = #tpu.pipeline_mode<synchronous>, transform_indices = @transform_5, window_bounds = array<i64: 1, 4>}, {transform_indices = @transform_6, window_bounds = array<i64: 1, 256, 4>}, {transform_indices = @transform_7, window_bounds = array<i64: 1, 256, 4>}]} {
    %c0 = arith.constant 0 : index
    %c0_0 = arith.constant 0 : index
    %0 = vector.load %arg3[%c0, %c0_0] : memref<5x16xf32, #tpu.memory_space<vmem>>, vector<5x16xf32>
    %c0_1 = arith.constant 0 : index
    %c0_2 = arith.constant 0 : index
    %c0_3 = arith.constant 0 : index
    %1 = vector.load %arg2[%c0_1, %c0_2, %c0_3] : memref<1x324x5xf32, #tpu.memory_space<vmem>>, vector<1x324x5xf32>
    %2 = vector.shape_cast %1 : vector<1x324x5xf32> to vector<324x5xf32>
    %cst = arith.constant dense<0.000000e+00> : vector<324x16xf32>
    %3 = tpu.matmul %2, %0, %cst {dimension_numbers = #tpu.dot_dimension_numbers<[1], [0], [0], [1], [0, 0, 1, 1], [], []>} : vector<324x5xf32>, vector<5x16xf32>, vector<324x16xf32> -> vector<324x16xf32>
    %cst_4 = arith.constant 0.000000e+00 : f32
    %cst_5 = arith.constant 6.000000e+00 : f32
    %4 = vector.broadcast %cst_4 : f32 to vector<324x16xf32>
    %5 = arith.maximumf %4, %3 : vector<324x16xf32>
    %6 = vector.broadcast %cst_5 : f32 to vector<324x16xf32>
    %7 = arith.minimumf %6, %5 : vector<324x16xf32>
    %c0_6 = arith.constant 0 : index
    %c0_7 = arith.constant 0 : index
    %8 = vector.load %arg10[%c0_6, %c0_7] : memref<324x16xf32, #tpu.memory_space<vmem>>, vector<324x16xf32>
    tpu.vector_store %arg10[%c0_6, %c0_7], %7 {strides = array<i32>} : memref<324x16xf32, #tpu.memory_space<vmem>>, vector<324x16xf32>,
    %c0_8 = arith.constant 0 : index
    %c0_9 = arith.constant 0 : index
    %c0_10 = arith.constant 0 : index
    %9 = vector.load %arg4[%c0_8, %c0_9, %c0_10] : memref<9x1x16xf32, #tpu.memory_space<vmem>>, vector<9x1x16xf32>
    %c0_11 = arith.constant 0 : index
    %c0_12 = arith.constant 0 : index
    %10 = vector.load %arg5[%c0_11, %c0_12] : memref<1x16xf32, #tpu.memory_space<vmem>>, vector<1x16xf32>
    %c0_i32 = arith.constant 0 : i32
    %c16_i32 = arith.constant 16 : i32
    %11 = arith.addi %c0_i32, %c16_i32 : i32
    %c1_i32 = arith.constant 1 : i32
    scf.for %arg12 = %c0_i32 to %11 step %c1_i32  : i32 {
      %c1_i32_27 = arith.constant 1 : i32
      %24 = arith.muli %arg12, %c1_i32_27 : i32
      %c0_i32_28 = arith.constant 0 : i32
      %25 = arith.addi %c0_i32_28, %24 : i32
      %cst_29 = arith.constant 0.000000e+00 : f32
      %26 = vector.broadcast %cst_29 : f32 to vector<16x16xf32>
      %c0_i32_30 = arith.constant 0 : i32
      %27 = arith.addi %c0_i32_30, %25 : i32
      %c18_i32 = arith.constant 18 : i32
      %28 = arith.muli %27, %c18_i32 : i32
      %29 = arith.index_cast %28 : i32 to index
      %c0_31 = arith.constant 0 : index
      %30 = vector.load %arg10[%29, %c0_31] : memref<324x16xf32, #tpu.memory_space<vmem>>, vector<18x16xf32>
      %31 = vector.extract_strided_slice %30 {offsets = [0, 0], sizes = [16, 16], strides = [1, 1]} : vector<18x16xf32> to vector<16x16xf32>
      %32 = vector.extract_strided_slice %9 {offsets = [0, 0, 0], sizes = [1, 1, 16], strides = [1, 1, 1]} : vector<9x1x16xf32> to vector<1x1x16xf32>
      %33 = vector.shape_cast %32 : vector<1x1x16xf32> to vector<1x16xf32>
      %34 = vector.broadcast %33 : vector<1x16xf32> to vector<16x16xf32>
      %35 = arith.mulf %31, %34 : vector<16x16xf32>
      %36 = arith.addf %26, %35 : vector<16x16xf32>
      %37 = vector.extract_strided_slice %30 {offsets = [1, 0], sizes = [16, 16], strides = [1, 1]} : vector<18x16xf32> to vector<16x16xf32>
      %38 = vector.extract_strided_slice %9 {offsets = [1, 0, 0], sizes = [1, 1, 16], strides = [1, 1, 1]} : vector<9x1x16xf32> to vector<1x1x16xf32>
      %39 = vector.shape_cast %38 : vector<1x1x16xf32> to vector<1x16xf32>
      %40 = vector.broadcast %39 : vector<1x16xf32> to vector<16x16xf32>
      %41 = arith.mulf %37, %40 : vector<16x16xf32>
      %42 = arith.addf %36, %41 : vector<16x16xf32>
      %43 = vector.extract_strided_slice %30 {offsets = [2, 0], sizes = [16, 16], strides = [1, 1]} : vector<18x16xf32> to vector<16x16xf32>
      %44 = vector.extract_strided_slice %9 {offsets = [2, 0, 0], sizes = [1, 1, 16], strides = [1, 1, 1]} : vector<9x1x16xf32> to vector<1x1x16xf32>
      %45 = vector.shape_cast %44 : vector<1x1x16xf32> to vector<1x16xf32>
      %46 = vector.broadcast %45 : vector<1x16xf32> to vector<16x16xf32>
      %47 = arith.mulf %43, %46 : vector<16x16xf32>
      %48 = arith.addf %42, %47 : vector<16x16xf32>
      %c1_i32_32 = arith.constant 1 : i32
      %49 = arith.addi %c1_i32_32, %25 : i32
      %c18_i32_33 = arith.constant 18 : i32
      %50 = arith.muli %49, %c18_i32_33 : i32
      %51 = arith.index_cast %50 : i32 to index
      %c0_34 = arith.constant 0 : index
      %52 = vector.load %arg10[%51, %c0_34] : memref<324x16xf32, #tpu.memory_space<vmem>>, vector<18x16xf32>
      %53 = vector.extract_strided_slice %52 {offsets = [0, 0], sizes = [16, 16], strides = [1, 1]} : vector<18x16xf32> to vector<16x16xf32>
      %54 = vector.extract_strided_slice %9 {offsets = [3, 0, 0], sizes = [1, 1, 16], strides = [1, 1, 1]} : vector<9x1x16xf32> to vector<1x1x16xf32>
      %55 = vector.shape_cast %54 : vector<1x1x16xf32> to vector<1x16xf32>
      %56 = vector.broadcast %55 : vector<1x16xf32> to vector<16x16xf32>
      %57 = arith.mulf %53, %56 : vector<16x16xf32>
      %58 = arith.addf %48, %57 : vector<16x16xf32>
      %59 = vector.extract_strided_slice %52 {offsets = [1, 0], sizes = [16, 16], strides = [1, 1]} : vector<18x16xf32> to vector<16x16xf32>
      %60 = vector.extract_strided_slice %9 {offsets = [4, 0, 0], sizes = [1, 1, 16], strides = [1, 1, 1]} : vector<9x1x16xf32> to vector<1x1x16xf32>
      %61 = vector.shape_cast %60 : vector<1x1x16xf32> to vector<1x16xf32>
      %62 = vector.broadcast %61 : vector<1x16xf32> to vector<16x16xf32>
      %63 = arith.mulf %59, %62 : vector<16x16xf32>
      %64 = arith.addf %58, %63 : vector<16x16xf32>
      %65 = vector.extract_strided_slice %52 {offsets = [2, 0], sizes = [16, 16], strides = [1, 1]} : vector<18x16xf32> to vector<16x16xf32>
      %66 = vector.extract_strided_slice %9 {offsets = [5, 0, 0], sizes = [1, 1, 16], strides = [1, 1, 1]} : vector<9x1x16xf32> to vector<1x1x16xf32>
      %67 = vector.shape_cast %66 : vector<1x1x16xf32> to vector<1x16xf32>
      %68 = vector.broadcast %67 : vector<1x16xf32> to vector<16x16xf32>
      %69 = arith.mulf %65, %68 : vector<16x16xf32>
      %70 = arith.addf %64, %69 : vector<16x16xf32>
      %c2_i32 = arith.constant 2 : i32
      %71 = arith.addi %c2_i32, %25 : i32
      %c18_i32_35 = arith.constant 18 : i32
      %72 = arith.muli %71, %c18_i32_35 : i32
      %73 = arith.index_cast %72 : i32 to index
      %c0_36 = arith.constant 0 : index
      %74 = vector.load %arg10[%73, %c0_36] : memref<324x16xf32, #tpu.memory_space<vmem>>, vector<18x16xf32>
      %75 = vector.extract_strided_slice %74 {offsets = [0, 0], sizes = [16, 16], strides = [1, 1]} : vector<18x16xf32> to vector<16x16xf32>
      %76 = vector.extract_strided_slice %9 {offsets = [6, 0, 0], sizes = [1, 1, 16], strides = [1, 1, 1]} : vector<9x1x16xf32> to vector<1x1x16xf32>
      %77 = vector.shape_cast %76 : vector<1x1x16xf32> to vector<1x16xf32>
      %78 = vector.broadcast %77 : vector<1x16xf32> to vector<16x16xf32>
      %79 = arith.mulf %75, %78 : vector<16x16xf32>
      %80 = arith.addf %70, %79 : vector<16x16xf32>
      %81 = vector.extract_strided_slice %74 {offsets = [1, 0], sizes = [16, 16], strides = [1, 1]} : vector<18x16xf32> to vector<16x16xf32>
      %82 = vector.extract_strided_slice %9 {offsets = [7, 0, 0], sizes = [1, 1, 16], strides = [1, 1, 1]} : vector<9x1x16xf32> to vector<1x1x16xf32>
      %83 = vector.shape_cast %82 : vector<1x1x16xf32> to vector<1x16xf32>
      %84 = vector.broadcast %83 : vector<1x16xf32> to vector<16x16xf32>
      %85 = arith.mulf %81, %84 : vector<16x16xf32>
      %86 = arith.addf %80, %85 : vector<16x16xf32>
      %87 = vector.extract_strided_slice %74 {offsets = [2, 0], sizes = [16, 16], strides = [1, 1]} : vector<18x16xf32> to vector<16x16xf32>
      %88 = vector.extract_strided_slice %9 {offsets = [8, 0, 0], sizes = [1, 1, 16], strides = [1, 1, 1]} : vector<9x1x16xf32> to vector<1x1x16xf32>
      %89 = vector.shape_cast %88 : vector<1x1x16xf32> to vector<1x16xf32>
      %90 = vector.broadcast %89 : vector<1x16xf32> to vector<16x16xf32>
      %91 = arith.mulf %87, %90 : vector<16x16xf32>
      %92 = arith.addf %86, %91 : vector<16x16xf32>
      %93 = vector.broadcast %10 : vector<1x16xf32> to vector<16x16xf32>
      %94 = arith.addf %92, %93 : vector<16x16xf32>
      %cst_37 = arith.constant 0.000000e+00 : f32
      %cst_38 = arith.constant 6.000000e+00 : f32
      %95 = vector.broadcast %cst_37 : f32 to vector<16x16xf32>
      %96 = arith.maximumf %95, %94 : vector<16x16xf32>
      %97 = vector.broadcast %cst_38 : f32 to vector<16x16xf32>
      %98 = arith.minimumf %97, %96 : vector<16x16xf32>
      %c16_i32_39 = arith.constant 16 : i32
      %99 = arith.muli %25, %c16_i32_39 : i32
      %100 = arith.index_cast %99 : i32 to index
      %c0_40 = arith.constant 0 : index
      %101 = vector.load %arg11[%100, %c0_40] : memref<256x16xf32, #tpu.memory_space<vmem>>, vector<16x16xf32>
      tpu.vector_store %arg11[%100, %c0_40], %98 {strides = array<i32>} : memref<256x16xf32, #tpu.memory_space<vmem>>, vector<16x16xf32>,
    }
    %c16_i32_13 = arith.constant 16 : i32
    %c0_14 = arith.constant 0 : index
    %c0_15 = arith.constant 0 : index
    %12 = vector.load %arg11[%c0_14, %c0_15] : memref<256x16xf32, #tpu.memory_space<vmem>>, vector<256x16xf32>
    %c0_16 = arith.constant 0 : index
    %c0_17 = arith.constant 0 : index
    %13 = vector.load %arg6[%c0_16, %c0_17] : memref<16x4xf32, #tpu.memory_space<vmem>>, vector<16x4xf32>
    %cst_18 = arith.constant dense<0.000000e+00> : vector<256x4xf32>
    %14 = tpu.matmul %12, %13, %cst_18 {dimension_numbers = #tpu.dot_dimension_numbers<[1], [0], [0], [1], [0, 0, 1, 1], [], []>} : vector<256x16xf32>, vector<16x4xf32>, vector<256x4xf32> -> vector<256x4xf32>
    %c0_19 = arith.constant 0 : index
    %c0_20 = arith.constant 0 : index
    %15 = vector.load %arg7[%c0_19, %c0_20] : memref<1x4xf32, #tpu.memory_space<vmem>>, vector<1x4xf32>
    %16 = vector.broadcast %15 : vector<1x4xf32> to vector<256x4xf32>
    %17 = arith.addf %14, %16 : vector<256x4xf32>
    %c0_21 = arith.constant 0 : index
    %c0_22 = arith.constant 0 : index
    %c0_23 = arith.constant 0 : index
    %18 = vector.load %arg8[%c0_21, %c0_22, %c0_23] : memref<1x256x4xf32, #tpu.memory_space<vmem>>, vector<1x256x4xf32>
    %19 = vector.shape_cast %18 : vector<1x256x4xf32> to vector<256x4xf32>
    %20 = arith.addf %17, %19 : vector<256x4xf32>
    %c0_24 = arith.constant 0 : index
    %c0_25 = arith.constant 0 : index
    %c0_26 = arith.constant 0 : index
    %21 = vector.load %arg9[%c0_24, %c0_25, %c0_26] : memref<1x256x4xf32, #tpu.memory_space<vmem>>, vector<1x256x4xf32>
    %22 = vector.shape_cast %21 : vector<1x256x4xf32> to vector<256x4xf32>
    %23 = vector.shape_cast %20 : vector<256x4xf32> to vector<1x256x4xf32>
    tpu.vector_store %arg9[%c0_24, %c0_25, %c0_26], %23 {strides = array<i32>} : memref<1x256x4xf32, #tpu.memory_space<vmem>>, vector<1x256x4xf32>,
    return
  }
  func.func @transform_0(%arg0: i32, %arg1: i32) -> (i32, i32, i32) {
    %c1_i32 = arith.constant 1 : i32
    %0 = arith.muli %arg0, %c1_i32 : i32
    %1 = arith.addi %0, %arg1 : i32
    %c0_i32 = arith.constant 0 : i32
    %c0_i32_0 = arith.constant 0 : i32
    %c0_i32_1 = arith.constant 0 : i32
    return %1, %c0_i32, %c0_i32_0 : i32, i32, i32
  }
  func.func @transform_1(%arg0: i32, %arg1: i32) -> (i32, i32) {
    %c0_i32 = arith.constant 0 : i32
    %c0_i32_0 = arith.constant 0 : i32
    %c0_i32_1 = arith.constant 0 : i32
    return %c0_i32, %c0_i32_0 : i32, i32
  }
  func.func @transform_2(%arg0: i32, %arg1: i32) -> (i32, i32, i32) {
    %c0_i32 = arith.constant 0 : i32
    %c0_i32_0 = arith.constant 0 : i32
    %c0_i32_1 = arith.constant 0 : i32
    %c0_i32_2 = arith.constant 0 : i32
    return %c0_i32, %c0_i32_0, %c0_i32_1 : i32, i32, i32
  }
  func.func @transform_3(%arg0: i32, %arg1: i32) -> (i32, i32) {
    %c0_i32 = arith.constant 0 : i32
    %c0_i32_0 = arith.constant 0 : i32
    %c0_i32_1 = arith.constant 0 : i32
    return %c0_i32, %c0_i32_0 : i32, i32
  }
  func.func @transform_4(%arg0: i32, %arg1: i32) -> (i32, i32) {
    %c0_i32 = arith.constant 0 : i32
    %c0_i32_0 = arith.constant 0 : i32
    %c0_i32_1 = arith.constant 0 : i32
    return %c0_i32, %c0_i32_0 : i32, i32
  }
  func.func @transform_5(%arg0: i32, %arg1: i32) -> (i32, i32) {
    %c0_i32 = arith.constant 0 : i32
    %c0_i32_0 = arith.constant 0 : i32
    %c0_i32_1 = arith.constant 0 : i32
    return %c0_i32, %c0_i32_0 : i32, i32
  }
  func.func @transform_6(%arg0: i32, %arg1: i32) -> (i32, i32, i32) {
    %c1_i32 = arith.constant 1 : i32
    %0 = arith.muli %arg0, %c1_i32 : i32
    %1 = arith.addi %0, %arg1 : i32
    %c0_i32 = arith.constant 0 : i32
    %c0_i32_0 = arith.constant 0 : i32
    %c0_i32_1 = arith.constant 0 : i32
    return %1, %c0_i32, %c0_i32_0 : i32, i32, i32
  }
  func.func @transform_7(%arg0: i32, %arg1: i32) -> (i32, i32, i32) {
    %c1_i32 = arith.constant 1 : i32
    %0 = arith.muli %arg0, %c1_i32 : i32
    %1 = arith.addi %0, %arg1 : i32
    %c0_i32 = arith.constant 0 : i32
    %c0_i32_0 = arith.constant 0 : i32
    %c0_i32_1 = arith.constant 0 : i32
    return %1, %c0_i32, %c0_i32_0 : i32, i32, i32
  }
}

</mosaic_0001>

<bundles_post_ra>
// kernel: tpu_custom_call.1
= control target key start
LH: loop header
LB: loop body
LE: loop exit
PB: predicated region body
PF: predicated region fallthrough
CT: control target
= control target key end

     0   :  { %s2129_s24 = smov 0   ;;  %s2131_s25 = smov 0   ;;  %s2662_s0 = inlined_call_operand.vmem [shape: f32[2,324,5], index: 0, kind: input, shape index: {}]   ;;  %s2663_s1 = inlined_call_operand.vmem [shape: f32[5,16], index: 1, kind: input, shape index: {}]   ;;  %s2664_s2 = inlined_call_operand.vmem [shape: f32[9,1,16], index: 2, kind: input, shape index: {}]   ;;  %s2665_s3 = inlined_call_operand.vmem [shape: f32[1,16], index: 3, kind: input, shape index: {}]   ;;  %s2666_s4 = inlined_call_operand.vmem [shape: f32[16,4], index: 4, kind: input, shape index: {}]   ;;  %s2667_s5 = inlined_call_operand.vmem [shape: f32[1,4], index: 5, kind: input, shape index: {}]   ;;  %s2668_s6 = inlined_call_operand.vmem [shape: f32[2,256,4], index: 6, kind: input, shape index: {}]   ;;  %s2669_s7 = inlined_call_operand.vmem [shape: f32[2,256,4], index: 7, kind: output, shape index: {}]  }
   0x1   :  { %s2133_s26 = smov 0  }
   0x2 LB: > { %s29_s27 = sadd.s32 1, %s2077_s25  ;;  %p1659_p0 = scmp.ge.s32.totalorder %s2081_s26, 1  ;;  %s2081_s26 = sphi %s2133_s26, %s17_s26   ;;  %s2077_s25 = sphi %s2131_s25, %s2671_s25   ;;  %s2073_s24 = sphi %s2129_s24, %s2670_s24  }
   0x3   : > { %p31_p1 = scmp.ge.s32.totalorder %s29_s27, 2  ;;  %p269_p2 = scmp.lt.s32.totalorder %s2081_s26, 3 }
   0x5   : > { %s2673_s27 = smov (%p31_p1, %s29_s27), 0  ;;  %p270_p3 = pnand %p1659_p0, %p269_p2 }
   0x6   : > { %v330_v0 = vld [vmem:[%s2663_s1] sm:$0x1f] (!%p270_p3)  ;;  %vm496_vm0 = vcmask (!%p270_p3), 1044480   ;;  %p310_p4 = scmp.lt.s32.totalorder (!%p270_p3), %s2073_s24, 1  ;;  %v2087_v1 = vmov (!%p270_p3), 0.0   ;;  %vm2088_vm1 = vmmov (!%p270_p3), 0  }
   0x7   : > { %273 = sbr.rel (%p270_p3) target bundleno = 675 (0x2a3), region = 48  ;;  %1837 = vmatprep.subr.mxu0 (!%p270_p3), %v2087_v1  ;;  %1839 = vmatprep.mubr.msk.f32.mxu0 (!%p270_p3), %vm2088_vm1, %v2087_v1  ;;  %vm372_vm2 = vcmask (!%p270_p3), 39936   ;;  %v2334_v43 = vld [vmem:[%s2664_s2] ss:$0 sm:$0xff] (!%p270_p3)  ;;  %v2339_v44 = vld [vmem:[%s2664_s2 + $0x1] ss:$0 sm:$0xff] (!%p270_p3) }
   0x8   : > { %1838 = vmatpush3.msk.msra.mxu0 (!%p270_p3), %vm496_vm0, %v330_v0  ;;  %2018 = vmatprep.subr.mxu1 (!%p270_p3), %v2087_v1  ;;  %v2344_v45 = vld [vmem:[%s2664_s2 + $0x2] ss:$0 sm:$0xff] (!%p270_p3)  ;;  %v2349_v46 = vld [vmem:[%s2664_s2 + $0x3] ss:$0 sm:$0xff] (!%p270_p3)  ;;  %v2354_v47 = vld [vmem:[%s2664_s2 + $0x4] ss:$0 sm:$0xff] (!%p270_p3) }
   0x9   : > { %2019 = vmatpush3.msk.msra.mxu1 (!%p270_p3), %vm496_vm0, %v330_v0  ;;  %1926 = vmatprep.mubr.msk.f32.mxu1 (!%p270_p3), %vm2088_vm1, %v2087_v1  ;;  %v2359_v48 = vld [vmem:[%s2664_s2 + $0x5] ss:$0 sm:$0xff] (!%p270_p3)  ;;  %v2364_v49 = vld [vmem:[%s2664_s2 + $0x6] ss:$0 sm:$0xff] (!%p270_p3)  ;;  %v2369_v50 = vld [vmem:[%s2664_s2 + $0x7] ss:$0 sm:$0xff] (!%p270_p3) }
   0xa   : > { %v2374_v51 = vld [vmem:[%s2664_s2 + $0x8] ss:$0 sm:$0xff] (!%p270_p3)  ;;  %v2379_v52 = vld [vmem:[%s2665_s3] ss:$0 sm:$0xff] (!%p270_p3)  ;;  %vm852_vm3 = vcmask (!%p270_p3), 130048   ;;  %vm893_vm4 = vcmask (!%p270_p3), 125952  }
   0xb   : > { %s2421_s20 = smov (!%p270_p3), 0  }
   0xe   : > { %s2675_s24 = smov (!%p310_p4, %s2073_s24), 1 }
   0xf   : > { %s2020_s30 = smul.u32 328, %s2675_s24  ;;  %s1759_s8 = sshll.u32 %s2675_s24, 8 }
  0x10   : > { %s2159_s11 = scalar_lea.vmem %s2668_s6, %s1759_s8  ;;  %s2164_s14 = scalar_lea.vmem %s2669_s7, %s1759_s8 }
  0x11   : > { %s2169_s17 = scalar_lea.vmem %s2662_s0, %s2020_s30 }
  0x12   : > { %v331_v2 = vld [vmem:[%s2169_s17] sm:$0xff]  ;;  %v332_v3 = vld [vmem:[%s2169_s17 + $0x8] sm:$0xff]  ;;  %v333_v5 = vld [vmem:[%s2169_s17 + $0x10] sm:$0xff] }
  0x13   : > { %1840 = vmatmul.mubr.msk.f32.vlgmr.msra.gmra.mrb[0].mxu0 %vm372_vm2, %v331_v2  ;;  %v360_v4 = vld [vmem:[%s2169_s17 + $0xe8] sm:$0xff]  ;;  %v361_v6 = vld [vmem:[%s2169_s17 + $0xf0] sm:$0xff]  ;;  %v334_v7 = vld [vmem:[%s2169_s17 + $0x18] sm:$0xff] }
  0x14   : > { %1842 = vmatprep.mubr.msk.f32.mxu0 %vm2088_vm1, %v2087_v1  ;;  %1927 = vmatmul.mubr.msk.f32.vlgmr.msra.gmra.mrb[0].mxu1 %vm372_vm2, %v360_v4  ;;  %v362_v8 = vld [vmem:[%s2169_s17 + $0xf8] sm:$0xff]  ;;  %v335_v9 = vld [vmem:[%s2169_s17 + $0x20] sm:$0xff]  ;;  %v336_v11 = vld [vmem:[%s2169_s17 + $0x28] sm:$0xff] }
  0x15   : > { %1929 = vmatprep.mubr.msk.f32.mxu1 %vm2088_vm1, %v2087_v1  ;;  %v363_v10 = vld [vmem:[%s2169_s17 + $0x100] sm:$0xff]  ;;  %v364_v12 = vld [vmem:[%s2169_s17 + $0x108] sm:$0xff]  ;;  %v337_v13 = vld [vmem:[%s2169_s17 + $0x30] sm:$0xff] }
  0x16   : > { %v365_v14 = vld [vmem:[%s2169_s17 + $0x110] sm:$0xff]  ;;  %v338_v15 = vld [vmem:[%s2169_s17 + $0x38] sm:$0xff]  ;;  %v339_v17 = vld [vmem:[%s2169_s17 + $0x40] sm:$0xff] }
  0x17   : > { %1843 = vmatmul.mubr.msk.f32.gmra.mrb[2].mxu0 %vm372_vm2, %v332_v3  ;;  %v366_v16 = vld [vmem:[%s2169_s17 + $0x118] sm:$0xff]  ;;  %v367_v18 = vld [vmem:[%s2169_s17 + $0x120] sm:$0xff]  ;;  %v340_v19 = vld [vmem:[%s2169_s17 + $0x48] sm:$0xff] }
  0x18   : > { %1845 = vmatprep.mubr.msk.f32.mxu0 %vm2088_vm1, %v2087_v1  ;;  %1930 = vmatmul.mubr.msk.f32.gmra.mrb[2].mxu1 %vm372_vm2, %v361_v6  ;;  %v368_v20 = vld [vmem:[%s2169_s17 + $0x128] sm:$0xff]  ;;  %v341_v21 = vld [vmem:[%s2169_s17 + $0x50] sm:$0xff]  ;;  %v342_v23 = vld [vmem:[%s2169_s17 + $0x58] sm:$0xff] }
  0x19   : > { %1932 = vmatprep.mubr.msk.f32.mxu1 %vm2088_vm1, %v2087_v1  ;;  %v369_v22 = vld [vmem:[%s2169_s17 + $0x130] sm:$0xff]  ;;  %v370_v24 = vld [vmem:[%s2169_s17 + $0x138] sm:$0xff]  ;;  %v343_v25 = vld [vmem:[%s2169_s17 + $0x60] sm:$0xff] }
  0x1a   : > { %v371_v26 = vld [vmem:[%s2169_s17 + $0x140] sm:$0xf]  ;;  %v344_v27 = vld [vmem:[%s2169_s17 + $0x68] sm:$0xff]  ;;  %v345_v28 = vld [vmem:[%s2169_s17 + $0x70] sm:$0xff] }
  0x1b   : > { %1846 = vmatmul.mubr.msk.f32.gmra.mrb[4].mxu0 %vm372_vm2, %v333_v5  ;;  %v346_v29 = vld [vmem:[%s2169_s17 + $0x78] sm:$0xff]  ;;  %v347_v30 = vld [vmem:[%s2169_s17 + $0x80] sm:$0xff]  ;;  %v348_v31 = vld [vmem:[%s2169_s17 + $0x88] sm:$0xff] }
  0x1c   : > { %1848 = vmatprep.mubr.msk.f32.mxu0 %vm2088_vm1, %v2087_v1  ;;  %1933 = vmatmul.mubr.msk.f32.gmra.mrb[4].mxu1 %vm372_vm2, %v362_v8  ;;  %v349_v32 = vld [vmem:[%s2169_s17 + $0x90] sm:$0xff]  ;;  %v350_v33 = vld [vmem:[%s2169_s17 + $0x98] sm:$0xff]  ;;  %v351_v34 = vld [vmem:[%s2169_s17 + $0xa0] sm:$0xff] }
  0x1d   : > { %1935 = vmatprep.mubr.msk.f32.mxu1 %vm2088_vm1, %v2087_v1  ;;  %v352_v35 = vld [vmem:[%s2169_s17 + $0xa8] sm:$0xff]  ;;  %v353_v36 = vld [vmem:[%s2169_s17 + $0xb0] sm:$0xff]  ;;  %v354_v37 = vld [vmem:[%s2169_s17 + $0xb8] sm:$0xff] }
  0x1e   : > { %v355_v38 = vld [vmem:[%s2169_s17 + $0xc0] sm:$0xff]  ;;  %v356_v39 = vld [vmem:[%s2169_s17 + $0xc8] sm:$0xff]  ;;  %v357_v40 = vld [vmem:[%s2169_s17 + $0xd0] sm:$0xff] }
  0x1f   : > { %1849 = vmatmul.mubr.msk.f32.gmra.mrb[6].mxu0 %vm372_vm2, %v334_v7  ;;  %v358_v41 = vld [vmem:[%s2169_s17 + $0xd8] sm:$0xff]  ;;  %v359_v42 = vld [vmem:[%s2169_s17 + $0xe0] sm:$0xff] }
  0x20   : > { %1851 = vmatprep.mubr.msk.f32.mxu0 %vm2088_vm1, %v2087_v1  ;;  %1936 = vmatmul.mubr.msk.f32.gmra.mrb[6].mxu1 %vm372_vm2, %v363_v10 }
  0x21   : > { %1938 = vmatprep.mubr.msk.f32.mxu1 %vm2088_vm1, %v2087_v1 }
  0x23   : > { %1852 = vmatmul.mubr.msk.f32.gmra.mrb[8].mxu0 %vm372_vm2, %v335_v9 }
  0x24   : > { %1854 = vmatprep.mubr.msk.f32.mxu0 %vm2088_vm1, %v2087_v1  ;;  %1939 = vmatmul.mubr.msk.f32.gmra.mrb[8].mxu1 %vm372_vm2, %v364_v12 }
  0x25   : > { %1941 = vmatprep.mubr.msk.f32.mxu1 %vm2088_vm1, %v2087_v1 }
  0x27   : > { %1855 = vmatmul.mubr.msk.f32.gmra.mrb[10].mxu0 %vm372_vm2, %v336_v11 }
  0x28   : > { %1857 = vmatprep.mubr.msk.f32.mxu0 %vm2088_vm1, %v2087_v1  ;;  %1942 = vmatmul.mubr.msk.f32.gmra.mrb[10].mxu1 %vm372_vm2, %v365_v14 }
  0x29   : > { %1944 = vmatprep.mubr.msk.f32.mxu1 %vm2088_vm1, %v2087_v1 }
  0x2b   : > { %1858 = vmatmul.mubr.msk.f32.gmra.mrb[12].mxu0 %vm372_vm2, %v337_v13 }
  0x2c   : > { %1860 = vmatprep.mubr.msk.f32.mxu0 %vm2088_vm1, %v2087_v1  ;;  %1945 = vmatmul.mubr.msk.f32.gmra.mrb[12].mxu1 %vm372_vm2, %v366_v16 }
  0x2d   : > { %1947 = vmatprep.mubr.msk.f32.mxu1 %vm2088_vm1, %v2087_v1 }
  0x2f   : > { %1861 = vmatmul.mubr.msk.f32.gmra.mrb[14].mxu0 %vm372_vm2, %v338_v15 }
  0x30   : > { %1863 = vmatprep.mubr.msk.f32.mxu0 %vm2088_vm1, %v2087_v1  ;;  %1948 = vmatmul.mubr.msk.f32.gmra.mrb[14].mxu1 %vm372_vm2, %v367_v18 }
  0x31   : > { %1950 = vmatprep.mubr.msk.f32.mxu1 %vm2088_vm1, %v2087_v1 }
  0x33   : > { %1864 = vmatmul.mubr.msk.f32.gmra.mrb[16].mxu0 %vm372_vm2, %v339_v17 }
  0x34   : > { %1866 = vmatprep.mubr.msk.f32.mxu0 %vm2088_vm1, %v2087_v1  ;;  %1951 = vmatmul.mubr.msk.f32.gmra.mrb[16].mxu1 %vm372_vm2, %v368_v20 }
  0x35   : > { %1953 = vmatprep.mubr.msk.f32.mxu1 %vm2088_vm1, %v2087_v1 }
  0x37   : > { %1867 = vmatmul.mubr.msk.f32.gmra.mrb[18].mxu0 %vm372_vm2, %v340_v19 }
  0x38   : > { %1869 = vmatprep.mubr.msk.f32.mxu0 %vm2088_vm1, %v2087_v1  ;;  %1954 = vmatmul.mubr.msk.f32.gmra.mrb[18].mxu1 %vm372_vm2, %v369_v22 }
  0x39   : > { %1956 = vmatprep.mubr.msk.f32.mxu1 %vm2088_vm1, %v2087_v1 }
  0x3b   : > { %1870 = vmatmul.mubr.msk.f32.gmra.mrb[20].mxu0 %vm372_vm2, %v341_v21 }
  0x3c   : > { %1872 = vmatprep.mubr.msk.f32.mxu0 %vm2088_vm1, %v2087_v1  ;;  %1957 = vmatmul.mubr.msk.f32.gmra.mrb[20].mxu1 %vm372_vm2, %v370_v24 }
  0x3d   : > { %1959 = vmatprep.mubr.msk.f32.mxu1 %vm2088_vm1, %v2087_v1 }
  0x3f   : > { %1873 = vmatmul.mubr.msk.f32.gmra.mrb[22].mxu0 %vm372_vm2, %v342_v23 }
  0x40   : > { %1875 = vmatprep.mubr.msk.f32.mxu0 %vm2088_vm1, %v2087_v1  ;;  %1960 = vmatmul.mubr.msk.f32.gmra.mrb[22].mxu1 %vm372_vm2, %v371_v26 }
  0x43   : > { %1876 = vmatmul.mubr.msk.f32.gmra.mrb[24].mxu0 %vm372_vm2, %v343_v25 }
  0x44   : > { %1878 = vmatprep.mubr.msk.f32.mxu0 %vm2088_vm1, %v2087_v1 }
  0x47   : > { %1879 = vmatmul.mubr.msk.f32.gmra.mrb[26].mxu0 %vm372_vm2, %v344_v27 }
  0x48   : > { %1881 = vmatprep.mubr.msk.f32.mxu0 %vm2088_vm1, %v2087_v1 }
  0x4b   : > { %1882 = vmatmul.mubr.msk.f32.gmra.mrb[28].mxu0 %vm372_vm2, %v345_v28 }
  0x4c   : > { %1884 = vmatprep.mubr.msk.f32.mxu0 %vm2088_vm1, %v2087_v1 }
  0x4f   : > { %1885 = vmatmul.mubr.msk.f32.gmra.mrb[30].mxu0 %vm372_vm2, %v346_v29 }
  0x50   : > { %1887 = vmatprep.mubr.msk.f32.mxu0 %vm2088_vm1, %v2087_v1 }
  0x53   : > { %1888 = vmatmul.mubr.msk.f32.gmra.mrb[32].mxu0 %vm372_vm2, %v347_v30 }
  0x54   : > { %1890 = vmatprep.mubr.msk.f32.mxu0 %vm2088_vm1, %v2087_v1 }
  0x57   : > { %1891 = vmatmul.mubr.msk.f32.gmra.mrb[34].mxu0 %vm372_vm2, %v348_v31 }
  0x58   : > { %1893 = vmatprep.mubr.msk.f32.mxu0 %vm2088_vm1, %v2087_v1 }
  0x5b   : > { %1894 = vmatmul.mubr.msk.f32.gmra.mrb[36].mxu0 %vm372_vm2, %v349_v32 }
  0x5c   : > { %1896 = vmatprep.mubr.msk.f32.mxu0 %vm2088_vm1, %v2087_v1 }
  0x5f   : > { %1897 = vmatmul.mubr.msk.f32.gmra.mrb[38].mxu0 %vm372_vm2, %v350_v33 }
  0x60   : > { %1899 = vmatprep.mubr.msk.f32.mxu0 %vm2088_vm1, %v2087_v1 }
  0x63   : > { %1900 = vmatmul.mubr.msk.f32.gmra.mrb[40].mxu0 %vm372_vm2, %v351_v34 }
  0x64   : > { %1902 = vmatprep.mubr.msk.f32.mxu0 %vm2088_vm1, %v2087_v1 }
  0x67   : > { %1903 = vmatmul.mubr.msk.f32.gmra.mrb[42].mxu0 %vm372_vm2, %v352_v35 }
  0x68   : > { %1905 = vmatprep.mubr.msk.f32.mxu0 %vm2088_vm1, %v2087_v1 }
  0x6b   : > { %1906 = vmatmul.mubr.msk.f32.gmra.mrb[44].mxu0 %vm372_vm2, %v353_v36 }
  0x6c   : > { %1908 = vmatprep.mubr.msk.f32.mxu0 %vm2088_vm1, %v2087_v1 }
  0x6f   : > { %1909 = vmatmul.mubr.msk.f32.gmra.mrb[46].mxu0 %vm372_vm2, %v354_v37 }
  0x70   : > { %1911 = vmatprep.mubr.msk.f32.mxu0 %vm2088_vm1, %v2087_v1 }
  0x73   : > { %1912 = vmatmul.mubr.msk.f32.gmra.mrb[48].mxu0 %vm372_vm2, %v355_v38 }
  0x74   : > { %1914 = vmatprep.mubr.msk.f32.mxu0 %vm2088_vm1, %v2087_v1 }
  0x77   : > { %1915 = vmatmul.mubr.msk.f32.gmra.mrb[50].mxu0 %vm372_vm2, %v356_v39 }
  0x78   : > { %1917 = vmatprep.mubr.msk.f32.mxu0 %vm2088_vm1, %v2087_v1 }
  0x7b   : > { %1918 = vmatmul.mubr.msk.f32.gmra.mrb[52].mxu0 %vm372_vm2, %v357_v40 }
  0x7c   : > { %1920 = vmatprep.mubr.msk.f32.mxu0 %vm2088_vm1, %v2087_v1 }
  0x7f   : > { %1921 = vmatmul.mubr.msk.f32.gmra.mrb[54].mxu0 %vm372_vm2, %v358_v41 }
  0x80   : > { %1923 = vmatprep.mubr.msk.f32.mxu0 %vm2088_vm1, %v2087_v1 }
  0x83   : > { %1924 = vmatmul.mubr.msk.f32.gmra.mrb[56].mxu0 %vm372_vm2, %v359_v42 }
  0xe6   : > { %v566_v53 = vpop.f32.mrb[0].mxu0 }
  0xe7   : > { %v770_v54 = vmax.f32 %v566_v53, 0.0  ;;  %v1841_v55 = vpop.f32.mrb[1].mxu0  ;;  %v711_v60 = vpop.f32.mrb[0].mxu1 }
  0xe8   : > { %v799_v61 = vmax.f32 %v711_v60, 0.0  ;;  %v1928_v62 = vpop.f32.mrb[1].mxu1 }
  0xe9   : > { %v811_v56 = vmin.f32 %v770_v54, 6.0 }
  0xea   : > { %v571_v57 = vpop.f32.mrb[2].mxu0  ;;  %v840_v1 = vmin.f32 %v799_v61, 6.0 }
  0xeb   : > { %853 = vst.msk [vmem:[#allocation2] sm:$0xff] %vm852_vm3, %v811_v56  ;;  %v771_v58 = vmax.f32 %v571_v57, 0.0  ;;  %v1844_v59 = vpop.f32.mrb[3].mxu0  ;;  %v716_v4 = vpop.f32.mrb[2].mxu1 }
  0xec   : > { %882 = vst.msk [vmem:[#allocation2 + $0xe8] sm:$0xff] %vm852_vm3, %v840_v1  ;;  %v800_v5 = vmax.f32 %v716_v4, 0.0  ;;  %v1931_v6 = vpop.f32.mrb[3].mxu1 }
  0xed   : > { %v812_v63 = vmin.f32 %v771_v58, 6.0 }
  0xee   : > { %v576_v0 = vpop.f32.mrb[4].mxu0  ;;  %v841_v9 = vmin.f32 %v800_v5, 6.0 }
  0xef   : > { %854 = vst.msk [vmem:[#allocation2 + $0x8] sm:$0xff] %vm852_vm3, %v812_v63  ;;  %v772_v2 = vmax.f32 %v576_v0, 0.0  ;;  %v1847_v3 = vpop.f32.mrb[5].mxu0  ;;  %v721_v12 = vpop.f32.mrb[4].mxu1 }
  0xf0   : > { %883 = vst.msk [vmem:[#allocation2 + $0xf0] sm:$0xff] %vm852_vm3, %v841_v9  ;;  %v801_v13 = vmax.f32 %v721_v12, 0.0  ;;  %v1934_v14 = vpop.f32.mrb[5].mxu1 }
  0xf1   : > { %v813_v7 = vmin.f32 %v772_v2, 6.0 }
  0xf2   : > { %v581_v8 = vpop.f32.mrb[6].mxu0  ;;  %v842_v17 = vmin.f32 %v801_v13, 6.0 }
  0xf3   : > { %855 = vst.msk [vmem:[#allocation2 + $0x10] sm:$0xff] %vm852_vm3, %v813_v7  ;;  %v773_v10 = vmax.f32 %v581_v8, 0.0  ;;  %v1850_v11 = vpop.f32.mrb[7].mxu0  ;;  %v726_v20 = vpop.f32.mrb[6].mxu1 }
  0xf4   : > { %884 = vst.msk [vmem:[#allocation2 + $0xf8] sm:$0xff] %vm852_vm3, %v842_v17  ;;  %v802_v21 = vmax.f32 %v726_v20, 0.0  ;;  %v1937_v22 = vpop.f32.mrb[7].mxu1 }
  0xf5   : > { %v814_v15 = vmin.f32 %v773_v10, 6.0 }
  0xf6   : > { %v586_v16 = vpop.f32.mrb[8].mxu0  ;;  %v843_v25 = vmin.f32 %v802_v21, 6.0 }
  0xf7   : > { %856 = vst.msk [vmem:[#allocation2 + $0x18] sm:$0xff] %vm852_vm3, %v814_v15  ;;  %v774_v18 = vmax.f32 %v586_v16, 0.0  ;;  %v1853_v19 = vpop.f32.mrb[9].mxu0  ;;  %v731_v28 = vpop.f32.mrb[8].mxu1 }
  0xf8   : > { %885 = vst.msk [vmem:[#allocation2 + $0x100] sm:$0xff] %vm852_vm3, %v843_v25  ;;  %v803_v29 = vmax.f32 %v731_v28, 0.0  ;;  %v1940_v30 = vpop.f32.mrb[9].mxu1 }
  0xf9   : > { %v815_v23 = vmin.f32 %v774_v18, 6.0 }
  0xfa   : > { %v591_v24 = vpop.f32.mrb[10].mxu0  ;;  %v844_v33 = vmin.f32 %v803_v29, 6.0 }
  0xfb   : > { %857 = vst.msk [vmem:[#allocation2 + $0x20] sm:$0xff] %vm852_vm3, %v815_v23  ;;  %v775_v26 = vmax.f32 %v591_v24, 0.0  ;;  %v1856_v27 = vpop.f32.mrb[11].mxu0  ;;  %v736_v36 = vpop.f32.mrb[10].mxu1 }
  0xfc   : > { %886 = vst.msk [vmem:[#allocation2 + $0x108] sm:$0xff] %vm852_vm3, %v844_v33  ;;  %v804_v37 = vmax.f32 %v736_v36, 0.0  ;;  %v1943_v38 = vpop.f32.mrb[11].mxu1 }
  0xfd   : > { %v816_v31 = vmin.f32 %v775_v26, 6.0 }
  0xfe   : > { %v596_v32 = vpop.f32.mrb[12].mxu0  ;;  %v845_v41 = vmin.f32 %v804_v37, 6.0 }
  0xff   : > { %858 = vst.msk [vmem:[#allocation2 + $0x28] sm:$0xff] %vm852_vm3, %v816_v31  ;;  %v776_v34 = vmax.f32 %v596_v32, 0.0  ;;  %v1859_v35 = vpop.f32.mrb[13].mxu0  ;;  %v741_v54 = vpop.f32.mrb[12].mxu1 }
 0x100   : > { %887 = vst.msk [vmem:[#allocation2 + $0x110] sm:$0xff] %vm852_vm3, %v845_v41  ;;  %v805_v55 = vmax.f32 %v741_v54, 0.0  ;;  %v1946_v56 = vpop.f32.mrb[13].mxu1 }
 0x101   : > { %v817_v39 = vmin.f32 %v776_v34, 6.0 }
 0x102   : > { %v601_v40 = vpop.f32.mrb[14].mxu0  ;;  %v846_v59 = vmin.f32 %v805_v55, 6.0 }
 0x103   : > { %859 = vst.msk [vmem:[#allocation2 + $0x30] sm:$0xff] %vm852_vm3, %v817_v39  ;;  %v777_v42 = vmax.f32 %v601_v40, 0.0  ;;  %v1862_v53 = vpop.f32.mrb[15].mxu0  ;;  %v746_v62 = vpop.f32.mrb[14].mxu1 }
 0x104   : > { %888 = vst.msk [vmem:[#allocation2 + $0x118] sm:$0xff] %vm852_vm3, %v846_v59  ;;  %v806_v63 = vmax.f32 %v746_v62, 0.0  ;;  %v1949_v0 = vpop.f32.mrb[15].mxu1 }
 0x105   : > { %v818_v57 = vmin.f32 %v777_v42, 6.0 }
 0x106   : > { %v606_v58 = vpop.f32.mrb[16].mxu0  ;;  %v847_v3 = vmin.f32 %v806_v63, 6.0 }
 0x107   : > { %860 = vst.msk [vmem:[#allocation2 + $0x38] sm:$0xff] %vm852_vm3, %v818_v57  ;;  %v778_v60 = vmax.f32 %v606_v58, 0.0  ;;  %v1865_v61 = vpop.f32.mrb[17].mxu0  ;;  %v751_v6 = vpop.f32.mrb[16].mxu1 }
 0x108   : > { %889 = vst.msk [vmem:[#allocation2 + $0x120] sm:$0xff] %vm852_vm3, %v847_v3  ;;  %v807_v7 = vmax.f32 %v751_v6, 0.0  ;;  %v1952_v8 = vpop.f32.mrb[17].mxu1 }
 0x109   : > { %v819_v1 = vmin.f32 %v778_v60, 6.0 }
 0x10a   : > { %v611_v2 = vpop.f32.mrb[18].mxu0  ;;  %v848_v11 = vmin.f32 %v807_v7, 6.0 }
 0x10b   : > { %861 = vst.msk [vmem:[#allocation2 + $0x40] sm:$0xff] %vm852_vm3, %v819_v1  ;;  %v779_v4 = vmax.f32 %v611_v2, 0.0  ;;  %v1868_v5 = vpop.f32.mrb[19].mxu0  ;;  %v756_v14 = vpop.f32.mrb[18].mxu1 }
 0x10c   : > { %890 = vst.msk [vmem:[#allocation2 + $0x128] sm:$0xff] %vm852_vm3, %v848_v11  ;;  %v808_v15 = vmax.f32 %v756_v14, 0.0  ;;  %v1955_v16 = vpop.f32.mrb[19].mxu1 }
 0x10d   : > { %v820_v9 = vmin.f32 %v779_v4, 6.0 }
 0x10e   : > { %v616_v10 = vpop.f32.mrb[20].mxu0  ;;  %v849_v19 = vmin.f32 %v808_v15, 6.0 }
 0x10f   : > { %862 = vst.msk [vmem:[#allocation2 + $0x48] sm:$0xff] %vm852_vm3, %v820_v9  ;;  %v780_v12 = vmax.f32 %v616_v10, 0.0  ;;  %v1871_v13 = vpop.f32.mrb[21].mxu0  ;;  %v761_v22 = vpop.f32.mrb[20].mxu1 }
 0x110   : > { %891 = vst.msk [vmem:[#allocation2 + $0x130] sm:$0xff] %vm852_vm3, %v849_v19  ;;  %v809_v23 = vmax.f32 %v761_v22, 0.0  ;;  %v1958_v24 = vpop.f32.mrb[21].mxu1 }
 0x111   : > { %v821_v17 = vmin.f32 %v780_v12, 6.0 }
 0x112   : > { %v621_v18 = vpop.f32.mrb[22].mxu0  ;;  %v850_v27 = vmin.f32 %v809_v23, 6.0 }
 0x113   : > { %863 = vst.msk [vmem:[#allocation2 + $0x50] sm:$0xff] %vm852_vm3, %v821_v17  ;;  %v781_v20 = vmax.f32 %v621_v18, 0.0  ;;  %v1874_v21 = vpop.f32.mrb[23].mxu0  ;;  %v766_v30 = vpop.f32.mrb[22].mxu1 }
 0x114   : > { %892 = vst.msk [vmem:[#allocation2 + $0x138] sm:$0xff] %vm852_vm3, %v850_v27  ;;  %v810_v31 = vmax.f32 %v766_v30, 0.0  ;;  %v1961_v32 = vpop.f32.mrb[23].mxu1 }
 0x115   : > { %v822_v25 = vmin.f32 %v781_v20, 6.0 }
 0x116   : > { %v626_v26 = vpop.f32.mrb[24].mxu0  ;;  %v851_v35 = vmin.f32 %v810_v31, 6.0 }
 0x117   : > { %864 = vst.msk [vmem:[#allocation2 + $0x58] sm:$0xff] %vm852_vm3, %v822_v25  ;;  %v782_v28 = vmax.f32 %v626_v26, 0.0  ;;  %v1877_v29 = vpop.f32.mrb[25].mxu0 }
 0x118   : > { %894 = vst.msk [vmem:[#allocation2 + $0x140] sm:$0xf] %vm893_vm4, %v851_v35 }
 0x119   : > { %v823_v33 = vmin.f32 %v782_v28, 6.0 }
 0x11a   : > { %v631_v34 = vpop.f32.mrb[26].mxu0 }
 0x11b   : > { %865 = vst.msk [vmem:[#allocation2 + $0x60] sm:$0xff] %vm852_vm3, %v823_v33  ;;  %v783_v36 = vmax.f32 %v631_v34, 0.0  ;;  %v1880_v37 = vpop.f32.mrb[27].mxu0 }
 0x11d   : > { %v824_v38 = vmin.f32 %v783_v36, 6.0 }
 0x11e   : > { %v636_v39 = vpop.f32.mrb[28].mxu0 }
 0x11f   : > { %866 = vst.msk [vmem:[#allocation2 + $0x68] sm:$0xff] %vm852_vm3, %v824_v38  ;;  %v784_v40 = vmax.f32 %v636_v39, 0.0  ;;  %v1883_v41 = vpop.f32.mrb[29].mxu0 }
 0x121   : > { %v825_v42 = vmin.f32 %v784_v40, 6.0 }
 0x122   : > { %v641_v53 = vpop.f32.mrb[30].mxu0 }
 0x123   : > { %867 = vst.msk [vmem:[#allocation2 + $0x70] sm:$0xff] %vm852_vm3, %v825_v42  ;;  %v785_v54 = vmax.f32 %v641_v53, 0.0  ;;  %v1886_v55 = vpop.f32.mrb[31].mxu0 }
 0x125   : > { %v826_v56 = vmin.f32 %v785_v54, 6.0 }
 0x126   : > { %v646_v57 = vpop.f32.mrb[32].mxu0 }
 0x127   : > { %868 = vst.msk [vmem:[#allocation2 + $0x78] sm:$0xff] %vm852_vm3, %v826_v56  ;;  %v786_v58 = vmax.f32 %v646_v57, 0.0  ;;  %v1889_v59 = vpop.f32.mrb[33].mxu0 }
 0x129   : > { %v827_v60 = vmin.f32 %v786_v58, 6.0 }
 0x12a   : > { %v651_v61 = vpop.f32.mrb[34].mxu0 }
 0x12b   : > { %869 = vst.msk [vmem:[#allocation2 + $0x80] sm:$0xff] %vm852_vm3, %v827_v60  ;;  %v787_v62 = vmax.f32 %v651_v61, 0.0  ;;  %v1892_v63 = vpop.f32.mrb[35].mxu0 }
 0x12d   : > { %v828_v0 = vmin.f32 %v787_v62, 6.0 }
 0x12e   : > { %v656_v1 = vpop.f32.mrb[36].mxu0 }
 0x12f   : > { %870 = vst.msk [vmem:[#allocation2 + $0x88] sm:$0xff] %vm852_vm3, %v828_v0  ;;  %v788_v2 = vmax.f32 %v656_v1, 0.0  ;;  %v1895_v3 = vpop.f32.mrb[37].mxu0 }
 0x131   : > { %v829_v4 = vmin.f32 %v788_v2, 6.0 }
 0x132   : > { %v661_v5 = vpop.f32.mrb[38].mxu0 }
 0x133   : > { %871 = vst.msk [vmem:[#allocation2 + $0x90] sm:$0xff] %vm852_vm3, %v829_v4  ;;  %v789_v6 = vmax.f32 %v661_v5, 0.0  ;;  %v1898_v7 = vpop.f32.mrb[39].mxu0 }
 0x135   : > { %v830_v8 = vmin.f32 %v789_v6, 6.0 }
 0x136   : > { %v666_v9 = vpop.f32.mrb[40].mxu0 }
 0x137   : > { %872 = vst.msk [vmem:[#allocation2 + $0x98] sm:$0xff] %vm852_vm3, %v830_v8  ;;  %v790_v10 = vmax.f32 %v666_v9, 0.0  ;;  %v1901_v11 = vpop.f32.mrb[41].mxu0 }
 0x139   : > { %v831_v12 = vmin.f32 %v790_v10, 6.0 }
 0x13a   : > { %v671_v13 = vpop.f32.mrb[42].mxu0 }
 0x13b   : > { %873 = vst.msk [vmem:[#allocation2 + $0xa0] sm:$0xff] %vm852_vm3, %v831_v12  ;;  %v791_v14 = vmax.f32 %v671_v13, 0.0  ;;  %v1904_v15 = vpop.f32.mrb[43].mxu0 }
 0x13d   : > { %v832_v16 = vmin.f32 %v791_v14, 6.0 }
 0x13e   : > { %v676_v17 = vpop.f32.mrb[44].mxu0 }
 0x13f   : > { %874 = vst.msk [vmem:[#allocation2 + $0xa8] sm:$0xff] %vm852_vm3, %v832_v16  ;;  %v792_v18 = vmax.f32 %v676_v17, 0.0  ;;  %v1907_v19 = vpop.f32.mrb[45].mxu0 }
 0x141   : > { %v833_v20 = vmin.f32 %v792_v18, 6.0 }
 0x142   : > { %v681_v21 = vpop.f32.mrb[46].mxu0 }
 0x143   : > { %875 = vst.msk [vmem:[#allocation2 + $0xb0] sm:$0xff] %vm852_vm3, %v833_v20  ;;  %v793_v22 = vmax.f32 %v681_v21, 0.0  ;;  %v1910_v23 = vpop.f32.mrb[47].mxu0 }
 0x145   : > { %v834_v24 = vmin.f32 %v793_v22, 6.0 }
 0x146   : > { %v686_v25 = vpop.f32.mrb[48].mxu0 }
 0x147   : > { %876 = vst.msk [vmem:[#allocation2 + $0xb8] sm:$0xff] %vm852_vm3, %v834_v24  ;;  %v794_v26 = vmax.f32 %v686_v25, 0.0  ;;  %v1913_v27 = vpop.f32.mrb[49].mxu0 }
 0x149   : > { %v835_v28 = vmin.f32 %v794_v26, 6.0 }
 0x14a   : > { %v691_v29 = vpop.f32.mrb[50].mxu0 }
 0x14b   : > { %877 = vst.msk [vmem:[#allocation2 + $0xc0] sm:$0xff] %vm852_vm3, %v835_v28  ;;  %v795_v30 = vmax.f32 %v691_v29, 0.0  ;;  %v1916_v31 = vpop.f32.mrb[51].mxu0 }
 0x14d   : > { %v836_v32 = vmin.f32 %v795_v30, 6.0 }
 0x14e   : > { %v696_v33 = vpop.f32.mrb[52].mxu0 }
 0x14f   : > { %878 = vst.msk [vmem:[#allocation2 + $0xc8] sm:$0xff] %vm852_vm3, %v836_v32  ;;  %v796_v34 = vmax.f32 %v696_v33, 0.0  ;;  %v1919_v35 = vpop.f32.mrb[53].mxu0 }
 0x151   : > { %v837_v36 = vmin.f32 %v796_v34, 6.0 }
 0x152   : > { %v701_v37 = vpop.f32.mrb[54].mxu0 }
 0x153   : > { %879 = vst.msk [vmem:[#allocation2 + $0xd0] sm:$0xff] %vm852_vm3, %v837_v36  ;;  %v797_v38 = vmax.f32 %v701_v37, 0.0  ;;  %v1922_v39 = vpop.f32.mrb[55].mxu0 }
 0x155   : > { %v838_v40 = vmin.f32 %v797_v38, 6.0 }
 0x156   : > { %v706_v41 = vpop.f32.mrb[56].mxu0 }
 0x157   : > { %880 = vst.msk [vmem:[#allocation2 + $0xd8] sm:$0xff] %vm852_vm3, %v838_v40  ;;  %v798_v42 = vmax.f32 %v706_v41, 0.0  ;;  %v1925_v53 = vpop.f32.mrb[57].mxu0 }
 0x159   : > { %v839_v54 = vmin.f32 %v798_v42, 6.0 }
 0x15b   : > { %881 = vst.msk [vmem:[#allocation2 + $0xe0] sm:$0xff] %vm852_vm3, %v839_v54 }
 0x15c LB: >> { %s911_s21 = smul.u32 18, %s2085_s20  ;;  %vm938_vm5 = vcmask 1046528   ;;  %vm960_vm6 = vcmask 1045504   ;;  %s1723_s23 = sshll.u32 %s2085_s20, 4  ;;  %s2085_s20 = sphi %s2421_s20, %s910_s20  }
 0x15d   : >> { %s1099_s24 = scalar_lea.vmem [#allocation3], %s1723_s23  ;;  %s910_s20 = sadd.s32 1, %s2085_s20  }
 0x15e   : >> { %s2427_s22 = scalar_lea.vmem [#allocation2], %s911_s21  ;;  %p907_p5 = scmp.ge.s32.totalorder %s910_s20, 16  }
 0x15f   : > { %vm1528_vm7 = vcmask (%p907_p5), 31744  }
 0x162   : >> { %v913_v55 = vld [vmem:[%s2427_s22] sm:$0xff]  ;;  %v914_v56 = vld [vmem:[%s2427_s22 + $0x8] sm:$0xff]  ;;  %v1710_v57 = vld [vmem:[%s2427_s22 + $0x12] sm:$0xff] }
 0x163   : >> { %v932_v58 = vmul.f32 %v2339_v44, %v913_v55  ;;  %v933_v59 = vmul.f32 %v2339_v44, %v914_v56  ;;  %v954_v60 = vmul.f32 %v2344_v45, %v913_v55  ;;  %v1711_v61 = vld [vmem:[%s2427_s22 + $0x1a] sm:$0xff]  ;;  %v922_v62 = vmul.f32 %v2334_v43, %v913_v55  ;;  %v1716_v6 = vld [vmem:[%s2427_s22 + $0x24] sm:$0xff]  ;;  %v1717_v9 = vld [vmem:[%s2427_s22 + $0x2c] sm:$0xff] }
 0x164   : >> { %v955_v63 = vmul.f32 %v2344_v45, %v914_v56  ;;  %v992_v0 = vmul.f32 %v2354_v47, %v1710_v57  ;;  %v993_v1 = vmul.f32 %v2354_v47, %v1711_v61  ;;  %v1013_v5 = vmul.f32 %v2359_v48, %v1710_v57  ;;  %v915_v13 = vld [vmem:[%s2427_s22 + $0x10] sm:$0x3]  ;;  %v1712_v21 = vld [vmem:[%s2427_s22 + $0x22] sm:$0x3]  ;;  %v1718_v38 = vld [vmem:[%s2427_s22 + $0x34] sm:$0x3] }
 0x165   : >> { %v939_v2 = vrot.slane %v932_v58, 1  ;;  %v940_v3 = vrot.slane %v933_v59, 1  ;;  %v961_v4 = vrot.slane %v954_v60, 2  ;;  %v1014_v8 = vmul.f32 %v2359_v48, %v1711_v61 }
 0x166   : >> { %v962_v7 = vrot.slane %v955_v63, 2  ;;  %v998_v11 = vrot.slane %v992_v0, 1  ;;  %v999_v12 = vrot.slane %v993_v1, 1  ;;  %v982_v16 = vmul.f32 %v2349_v46, %v1710_v57 }
 0x167   : >> { %v941_v10 = vsel %vm938_vm5, %v939_v2, %v940_v3  ;;  %v1050_v17 = vmul.f32 %v2369_v50, %v1716_v6  ;;  %v1019_v18 = vrot.slane %v1013_v5, 2  ;;  %v1020_v19 = vrot.slane %v1014_v8, 2 }
 0x168   : >> { %v946_v14 = vadd.f32 %v941_v10, %v922_v62  ;;  %v963_v15 = vsel %vm960_vm6, %v961_v4, %v962_v7  ;;  %v1051_v20 = vmul.f32 %v2369_v50, %v1717_v9  ;;  %v1040_v23 = vmul.f32 %v2364_v49, %v1716_v6 }
 0x169   : >> { %v1071_v24 = vmul.f32 %v2374_v51, %v1716_v6  ;;  %v934_v25 = vmul.f32 %v2339_v44, %v915_v13  ;;  %v1000_v26 = vsel %vm938_vm5, %v998_v11, %v999_v12  ;;  %v1072_v27 = vmul.f32 %v2374_v51, %v1717_v9 }
 0x16a   : >> { %v968_v22 = vadd.f32 %v963_v15, %v946_v14  ;;  %v923_v28 = vmul.f32 %v2334_v43, %v914_v56  ;;  %v956_v29 = vmul.f32 %v2344_v45, %v915_v13  ;;  %v1056_v31 = vrot.slane %v1050_v17, 1 }
 0x16b   : >> { %v942_v32 = vrot.slane %v934_v25, 1  ;;  %v994_v33 = vmul.f32 %v2354_v47, %v1712_v21  ;;  %v1021_v34 = vsel %vm960_vm6, %v1019_v18, %v1020_v19  ;;  %v1057_v35 = vrot.slane %v1051_v20, 1 }
 0x16c   : >> { %v984_v30 = vadd.f32 %v982_v16, %v968_v22  ;;  %v964_v36 = vrot.slane %v956_v29, 2  ;;  %v1015_v37 = vmul.f32 %v2359_v48, %v1712_v21  ;;  %v1077_v40 = vrot.slane %v1071_v24, 2  ;;  %v1134_v22 = vld [vmem:[%s2666_s4] sm:$0xff] (%p907_p5) }
 0x16d   : >> { %v943_v41 = vsel %vm938_vm5, %v940_v3, %v942_v32  ;;  %v1001_v42 = vrot.slane %v994_v33, 1  ;;  %v1078_v53 = vrot.slane %v1072_v27, 2  ;;  %v983_v56 = vmul.f32 %v2349_v46, %v1711_v61 }
 0x16e   : >> { %v1005_v39 = vadd.f32 %v1000_v26, %v984_v30  ;;  %v947_v54 = vadd.f32 %v943_v41, %v923_v28  ;;  %v965_v55 = vsel %vm960_vm6, %v962_v7, %v964_v36  ;;  %v1022_v58 = vrot.slane %v1015_v37, 2 }
 0x16f   : >> { %v1052_v59 = vmul.f32 %v2369_v50, %v1718_v38  ;;  %v1058_v60 = vsel %vm938_vm5, %v1056_v31, %v1057_v35  ;;  %v1002_v0 = vsel %vm938_vm5, %v999_v12, %v1001_v42  ;;  %v1073_v1 = vmul.f32 %v2374_v51, %v1718_v38 }
 0x170   : >> { %v1026_v57 = vadd.f32 %v1021_v34, %v1005_v39  ;;  %v969_v62 = vadd.f32 %v965_v55, %v947_v54  ;;  %v1079_v2 = vsel %vm960_vm6, %v1077_v40, %v1078_v53  ;;  %v1023_v5 = vsel %vm960_vm6, %v1020_v19, %v1022_v58 }
 0x171   : >> { %v1059_v61 = vrot.slane %v1052_v59, 1  ;;  %v1041_v7 = vmul.f32 %v2364_v49, %v1717_v9  ;;  %v1080_v10 = vrot.slane %v1073_v1, 2  ;;  %v1465_v59 = vld [vmem:[%s2159_s11 + $0x8] sm:$0xff] (%p907_p5) }
 0x172   : >> { %v1042_v63 = vadd.f32 %v1040_v23, %v1026_v57  ;;  %v985_v3 = vadd.f32 %v983_v56, %v969_v62  ;;  %v1135_v23 = vld [vmem:[%s2666_s4 + $0x8] sm:$0xff] (%p907_p5)  ;;  %v2523_v57 = vld [vmem:[%s2667_s5] ss:$0 sm:$0xff] (%p907_p5) }
 0x173   : >> { %v1060_v12 = vsel %vm938_vm5, %v1057_v35, %v1059_v61  ;;  %v1081_v16 = vsel %vm960_vm6, %v1078_v53, %v1080_v10  ;;  %v2014_v25 = vpack.c.bf16 (%p907_p5), %v1135_v23, %v1134_v22  ;;  %v1470_v22 = vld [vmem:[%s2159_s11 + $0x30] sm:$0xff] (%p907_p5) }
 0x174   : >> { %v1063_v4 = vadd.f32 %v1058_v60, %v1042_v63  ;;  %v1006_v6 = vadd.f32 %v1002_v0, %v985_v3  ;;  %v1464_v63 = vld [vmem:[%s2159_s11] sm:$0xff] (%p907_p5) }
 0x175   : > { %2015 = vmatprep.subr.bf16.mxu1 (%p907_p5), %v2014_v25 }
 0x176   : >> { %v1084_v8 = vadd.f32 %v1079_v2, %v1063_v4  ;;  %v1027_v11 = vadd.f32 %v1023_v5, %v1006_v6  ;;  %2017 = vmatpush3.bf16.msra.mxu1 (%p907_p5), %v2014_v25  ;;  %v1467_v4 = vld [vmem:[%s2159_s11 + $0x18] sm:$0xff] (%p907_p5)  ;;  %v1466_v6 = vld [vmem:[%s2159_s11 + $0x10] sm:$0xff] (%p907_p5) }
 0x178   : >> { %v1092_v13 = vadd.f32 %v2379_v52, %v1084_v8  ;;  %v1043_v14 = vadd.f32 %v1041_v7, %v1027_v11 }
 0x17a   : >> { %v1094_v15 = vmax.f32 %v1092_v13, 0.0  ;;  %v1064_v17 = vadd.f32 %v1060_v12, %v1043_v14  ;;  %v1469_v13 = vld [vmem:[%s2159_s11 + $0x28] sm:$0xff] (%p907_p5) }
 0x17c   : >> { %v1096_v18 = vmin.f32 %v1094_v15, 6.0  ;;  %v1085_v20 = vadd.f32 %v1081_v16, %v1064_v17  ;;  %v1468_v15 = vld [vmem:[%s2159_s11 + $0x20] sm:$0xff] (%p907_p5) }
 0x17e   : >> { %1100 = vst.msk [vmem:[%s1099_s24] sm:$0xff] %vm852_vm3, %v1096_v18  ;;  %v1093_v9 = vadd.f32 %v2379_v52, %v1085_v20  ;;  %909 = sbr.rel (!%p907_p5) target bundleno = 348 (0x15c), region = 92 }
 0x180   : >> { %v1095_v19 = vmax.f32 %v1093_v9, 0.0  ;;  %v1471_v9 = vld [vmem:[%s2159_s11 + $0x38] sm:$0xff] (%p907_p5) }
 0x182   : >> { %v1097_v21 = vmin.f32 %v1095_v19, 6.0 }
 0x184   : >> { %1101 = vst.msk [vmem:[%s1099_s24 + $0x8] sm:$0xff] %vm852_vm3, %v1097_v21 }
 0x18b   : > { %v1102_v24 = vld [vmem:[#allocation3] sm:$0xff]  ;;  %v1103_v26 = vld [vmem:[#allocation3 + $0x8] sm:$0xff]  ;;  %v1104_v27 = vld [vmem:[#allocation3 + $0x10] sm:$0xff] }
 0x18c   : > { %1966 = vmatprep.mubr.msk.f32.mxu1 %vm852_vm3, %v1102_v24  ;;  %v1105_v43 = vld [vmem:[#allocation3 + $0x18] sm:$0xff]  ;;  %v1106_v44 = vld [vmem:[#allocation3 + $0x20] sm:$0xff]  ;;  %v1107_v45 = vld [vmem:[#allocation3 + $0x28] sm:$0xff] }
 0x18d   : > { %1967 = vmatmul.mubr.msk.f32.vlgmr.msra.gmra.mrb[24].mxu1 %vm852_vm3, %v1103_v26  ;;  %v1108_v46 = vld [vmem:[#allocation3 + $0x30] sm:$0xff]  ;;  %v1109_v47 = vld [vmem:[#allocation3 + $0x38] sm:$0xff]  ;;  %v1110_v48 = vld [vmem:[#allocation3 + $0x40] sm:$0xff] }
 0x18e   : > { %1969 = vmatprep.mubr.msk.f32.mxu1 %vm852_vm3, %v1104_v27  ;;  %v1111_v49 = vld [vmem:[#allocation3 + $0x48] sm:$0xff]  ;;  %v1112_v50 = vld [vmem:[#allocation3 + $0x50] sm:$0xff]  ;;  %v1113_v51 = vld [vmem:[#allocation3 + $0x58] sm:$0xff] }
 0x18f   : > { %v1114_v52 = vld [vmem:[#allocation3 + $0x60] sm:$0xff]  ;;  %v1115_v28 = vld [vmem:[#allocation3 + $0x68] sm:$0xff]  ;;  %v1116_v29 = vld [vmem:[#allocation3 + $0x70] sm:$0xff] }
 0x190   : > { %v1117_v30 = vld [vmem:[#allocation3 + $0x78] sm:$0xff]  ;;  %v1118_v31 = vld [vmem:[#allocation3 + $0x80] sm:$0xff]  ;;  %v1119_v32 = vld [vmem:[#allocation3 + $0x88] sm:$0xff] }
 0x191   : > { %1970 = vmatmul.mubr.msk.f32.gmra.mrb[26].mxu1 %vm852_vm3, %v1105_v43  ;;  %v1120_v33 = vld [vmem:[#allocation3 + $0x90] sm:$0xff]  ;;  %v1121_v34 = vld [vmem:[#allocation3 + $0x98] sm:$0xff]  ;;  %v1122_v35 = vld [vmem:[#allocation3 + $0xa0] sm:$0xff] }
 0x192   : > { %1972 = vmatprep.mubr.msk.f32.mxu1 %vm852_vm3, %v1106_v44  ;;  %v1123_v36 = vld [vmem:[#allocation3 + $0xa8] sm:$0xff]  ;;  %v1124_v37 = vld [vmem:[#allocation3 + $0xb0] sm:$0xff]  ;;  %v1125_v38 = vld [vmem:[#allocation3 + $0xb8] sm:$0xff] }
 0x193   : > { %v1126_v39 = vld [vmem:[#allocation3 + $0xc0] sm:$0xff]  ;;  %v1127_v40 = vld [vmem:[#allocation3 + $0xc8] sm:$0xff]  ;;  %v1128_v41 = vld [vmem:[#allocation3 + $0xd0] sm:$0xff] }
 0x194   : > { %v1129_v42 = vld [vmem:[#allocation3 + $0xd8] sm:$0xff]  ;;  %v1130_v53 = vld [vmem:[#allocation3 + $0xe0] sm:$0xff]  ;;  %v1131_v54 = vld [vmem:[#allocation3 + $0xe8] sm:$0xff] }
 0x195   : > { %1973 = vmatmul.mubr.msk.f32.gmra.mrb[28].mxu1 %vm852_vm3, %v1107_v45  ;;  %v1132_v55 = vld [vmem:[#allocation3 + $0xf0] sm:$0xff]  ;;  %v1133_v56 = vld [vmem:[#allocation3 + $0xf8] sm:$0xff]  ;;  %v1473_v27 = vld [vmem:[%s2159_s11 + $0x48] sm:$0xff] }
 0x196   : > { %1975 = vmatprep.mubr.msk.f32.mxu1 %vm852_vm3, %v1108_v46  ;;  %v1472_v45 = vld [vmem:[%s2159_s11 + $0x40] sm:$0xff] }
 0x199   : > { %1976 = vmatmul.mubr.msk.f32.gmra.mrb[30].mxu1 %vm852_vm3, %v1109_v47 }
 0x19a   : > { %1978 = vmatprep.mubr.msk.f32.mxu1 %vm852_vm3, %v1110_v48 }
 0x19d   : > { %1979 = vmatmul.mubr.msk.f32.gmra.mrb[32].mxu1 %vm852_vm3, %v1111_v49 }
 0x19e   : > { %1981 = vmatprep.mubr.msk.f32.mxu1 %vm852_vm3, %v1112_v50  ;;  %v1475_v50 = vld [vmem:[%s2159_s11 + $0x58] sm:$0xff] }
 0x1a1   : > { %1982 = vmatmul.mubr.msk.f32.gmra.mrb[34].mxu1 %vm852_vm3, %v1113_v51 }
 0x1a2   : > { %1984 = vmatprep.mubr.msk.f32.mxu1 %vm852_vm3, %v1114_v52 }
 0x1a5   : > { %1985 = vmatmul.mubr.msk.f32.gmra.mrb[36].mxu1 %vm852_vm3, %v1115_v28  ;;  %v1474_v28 = vld [vmem:[%s2159_s11 + $0x50] sm:$0xff] }
 0x1a6   : > { %1987 = vmatprep.mubr.msk.f32.mxu1 %vm852_vm3, %v1116_v29 }
 0x1a9   : > { %1988 = vmatmul.mubr.msk.f32.gmra.mrb[38].mxu1 %vm852_vm3, %v1117_v30 }
 0x1aa   : > { %1990 = vmatprep.mubr.msk.f32.mxu1 %vm852_vm3, %v1118_v31 }
 0x1ad   : > { %1991 = vmatmul.mubr.msk.f32.gmra.mrb[40].mxu1 %vm852_vm3, %v1119_v32 }
 0x1ae   : > { %1993 = vmatprep.mubr.msk.f32.mxu1 %vm852_vm3, %v1120_v33  ;;  %v1477_v33 = vld [vmem:[%s2159_s11 + $0x68] sm:$0xff] }
 0x1b1   : > { %1994 = vmatmul.mubr.msk.f32.gmra.mrb[42].mxu1 %vm852_vm3, %v1121_v34 }
 0x1b2   : > { %1996 = vmatprep.mubr.msk.f32.mxu1 %vm852_vm3, %v1122_v35 }
 0x1b5   : > { %1997 = vmatmul.mubr.msk.f32.gmra.mrb[44].mxu1 %vm852_vm3, %v1123_v36  ;;  %v1476_v36 = vld [vmem:[%s2159_s11 + $0x60] sm:$0xff] }
 0x1b6   : > { %1999 = vmatprep.mubr.msk.f32.mxu1 %vm852_vm3, %v1124_v37 }
 0x1b9   : > { %2000 = vmatmul.mubr.msk.f32.gmra.mrb[46].mxu1 %vm852_vm3, %v1125_v38 }
 0x1ba   : > { %2002 = vmatprep.mubr.msk.f32.mxu1 %vm852_vm3, %v1126_v39 }
 0x1bd   : > { %2003 = vmatmul.mubr.msk.f32.gmra.mrb[48].mxu1 %vm852_vm3, %v1127_v40 }
 0x1be   : > { %2005 = vmatprep.mubr.msk.f32.mxu1 %vm852_vm3, %v1128_v41  ;;  %v1479_v41 = vld [vmem:[%s2159_s11 + $0x78] sm:$0xff] }
 0x1c1   : > { %2006 = vmatmul.mubr.msk.f32.gmra.mrb[50].mxu1 %vm852_vm3, %v1129_v42 }
 0x1c2   : > { %2008 = vmatprep.mubr.msk.f32.mxu1 %vm852_vm3, %v1130_v53 }
 0x1c5   : > { %2009 = vmatmul.mubr.msk.f32.gmra.mrb[52].mxu1 %vm852_vm3, %v1131_v54  ;;  %v1478_v54 = vld [vmem:[%s2159_s11 + $0x70] sm:$0xff] }
 0x1c6   : > { %2011 = vmatprep.mubr.msk.f32.mxu1 %vm852_vm3, %v1132_v55 }
 0x1c9   : > { %2012 = vmatmul.mubr.msk.f32.gmra.mrb[54].mxu1 %vm852_vm3, %v1133_v56 }
 0x260   : > { %v1968_v58 = vpop.f32.mrb[24].mxu1 }
 0x261   : > { %v1311_v60 = vadd.f32 %v1968_v58, %v2523_v57  ;;  %v1305_v62 = vpop.f32.mrb[25].mxu1 }
 0x262   : > { %v1306_v0 = vadd.f32 %v2523_v57, %v1305_v62 }
 0x263   : > { %v1497_v1 = vadd.f32 %v1465_v59, %v1311_v60  ;;  %v1481_v60 = vld [vmem:[%s2159_s11 + $0x88] sm:$0xff] }
 0x264   : > { %v1496_v2 = vadd.f32 %v1464_v63, %v1306_v0  ;;  %v1971_v3 = vpop.f32.mrb[26].mxu1  ;;  %v1480_v0 = vld [vmem:[%s2159_s11 + $0x80] sm:$0xff] }
 0x265   : > { %1530 = vst.msk [vmem:[%s2164_s14 + $0x8] sm:$0xff] %vm1528_vm7, %v1497_v1  ;;  %v1321_v5 = vadd.f32 %v1971_v3, %v2523_v57  ;;  %v1315_v61 = vpop.f32.mrb[27].mxu1 }
 0x266   : > { %1529 = vst.msk [vmem:[%s2164_s14] sm:$0xff] %vm1528_vm7, %v1496_v2  ;;  %v1316_v7 = vadd.f32 %v2523_v57, %v1315_v61 }
 0x267   : > { %v1499_v8 = vadd.f32 %v1467_v4, %v1321_v5  ;;  %v1483_v5 = vld [vmem:[%s2159_s11 + $0x98] sm:$0xff] }
 0x268   : > { %v1498_v10 = vadd.f32 %v1466_v6, %v1316_v7  ;;  %v1974_v11 = vpop.f32.mrb[28].mxu1  ;;  %v1482_v7 = vld [vmem:[%s2159_s11 + $0x90] sm:$0xff] }
 0x269   : > { %1532 = vst.msk [vmem:[%s2164_s14 + $0x18] sm:$0xff] %vm1528_vm7, %v1499_v8  ;;  %v1331_v12 = vadd.f32 %v1974_v11, %v2523_v57  ;;  %v1325_v14 = vpop.f32.mrb[29].mxu1 }
 0x26a   : > { %1531 = vst.msk [vmem:[%s2164_s14 + $0x10] sm:$0xff] %vm1528_vm7, %v1498_v10  ;;  %v1326_v16 = vadd.f32 %v2523_v57, %v1325_v14 }
 0x26b   : > { %v1501_v17 = vadd.f32 %v1469_v13, %v1331_v12  ;;  %v1485_v12 = vld [vmem:[%s2159_s11 + $0xa8] sm:$0xff] }
 0x26c   : > { %v1500_v18 = vadd.f32 %v1468_v15, %v1326_v16  ;;  %v1977_v20 = vpop.f32.mrb[30].mxu1  ;;  %v1484_v16 = vld [vmem:[%s2159_s11 + $0xa0] sm:$0xff] }
 0x26d   : > { %1534 = vst.msk [vmem:[%s2164_s14 + $0x28] sm:$0xff] %vm1528_vm7, %v1501_v17  ;;  %v1341_v19 = vadd.f32 %v1977_v20, %v2523_v57  ;;  %v1335_v21 = vpop.f32.mrb[31].mxu1 }
 0x26e   : > { %1533 = vst.msk [vmem:[%s2164_s14 + $0x20] sm:$0xff] %vm1528_vm7, %v1500_v18  ;;  %v1336_v23 = vadd.f32 %v2523_v57, %v1335_v21 }
 0x26f   : > { %v1503_v24 = vadd.f32 %v1471_v9, %v1341_v19  ;;  %v1487_v19 = vld [vmem:[%s2159_s11 + $0xb8] sm:$0xff] }
 0x270   : > { %v1502_v25 = vadd.f32 %v1470_v22, %v1336_v23  ;;  %v1980_v26 = vpop.f32.mrb[32].mxu1  ;;  %v1486_v23 = vld [vmem:[%s2159_s11 + $0xb0] sm:$0xff] }
 0x271   : > { %1536 = vst.msk [vmem:[%s2164_s14 + $0x38] sm:$0xff] %vm1528_vm7, %v1503_v24  ;;  %v1351_v43 = vadd.f32 %v1980_v26, %v2523_v57  ;;  %v1345_v44 = vpop.f32.mrb[33].mxu1 }
 0x272   : > { %1535 = vst.msk [vmem:[%s2164_s14 + $0x30] sm:$0xff] %vm1528_vm7, %v1502_v25  ;;  %v1346_v46 = vadd.f32 %v2523_v57, %v1345_v44 }
 0x273   : > { %v1505_v47 = vadd.f32 %v1473_v27, %v1351_v43  ;;  %v1489_v43 = vld [vmem:[%s2159_s11 + $0xc8] sm:$0xff] }
 0x274   : > { %v1504_v48 = vadd.f32 %v1472_v45, %v1346_v46  ;;  %v1983_v49 = vpop.f32.mrb[34].mxu1  ;;  %v1488_v46 = vld [vmem:[%s2159_s11 + $0xc0] sm:$0xff] }
 0x275   : > { %1538 = vst.msk [vmem:[%s2164_s14 + $0x48] sm:$0xff] %vm1528_vm7, %v1505_v47  ;;  %v1361_v51 = vadd.f32 %v1983_v49, %v2523_v57  ;;  %v1355_v52 = vpop.f32.mrb[35].mxu1 }
 0x276   : > { %1537 = vst.msk [vmem:[%s2164_s14 + $0x40] sm:$0xff] %vm1528_vm7, %v1504_v48  ;;  %v1356_v29 = vadd.f32 %v2523_v57, %v1355_v52 }
 0x277   : > { %v1507_v30 = vadd.f32 %v1475_v50, %v1361_v51  ;;  %v1491_v51 = vld [vmem:[%s2159_s11 + $0xd8] sm:$0xff] }
 0x278   : > { %v1506_v31 = vadd.f32 %v1474_v28, %v1356_v29  ;;  %v1986_v32 = vpop.f32.mrb[36].mxu1  ;;  %v1490_v29 = vld [vmem:[%s2159_s11 + $0xd0] sm:$0xff] }
 0x279   : > { %1540 = vst.msk [vmem:[%s2164_s14 + $0x58] sm:$0xff] %vm1528_vm7, %v1507_v30  ;;  %v1371_v34 = vadd.f32 %v1986_v32, %v2523_v57  ;;  %v1365_v35 = vpop.f32.mrb[37].mxu1 }
 0x27a   : > { %1539 = vst.msk [vmem:[%s2164_s14 + $0x50] sm:$0xff] %vm1528_vm7, %v1506_v31  ;;  %v1366_v37 = vadd.f32 %v2523_v57, %v1365_v35 }
 0x27b   : > { %v1509_v38 = vadd.f32 %v1477_v33, %v1371_v34  ;;  %v1493_v34 = vld [vmem:[%s2159_s11 + $0xe8] sm:$0xff] }
 0x27c   : > { %v1508_v39 = vadd.f32 %v1476_v36, %v1366_v37  ;;  %v1989_v40 = vpop.f32.mrb[38].mxu1  ;;  %v1492_v37 = vld [vmem:[%s2159_s11 + $0xe0] sm:$0xff] }
 0x27d   : > { %1542 = vst.msk [vmem:[%s2164_s14 + $0x68] sm:$0xff] %vm1528_vm7, %v1509_v38  ;;  %v1381_v42 = vadd.f32 %v1989_v40, %v2523_v57  ;;  %v1375_v53 = vpop.f32.mrb[39].mxu1 }
 0x27e   : > { %1541 = vst.msk [vmem:[%s2164_s14 + $0x60] sm:$0xff] %vm1528_vm7, %v1508_v39  ;;  %v1376_v55 = vadd.f32 %v2523_v57, %v1375_v53 }
 0x27f   : > { %v1511_v56 = vadd.f32 %v1479_v41, %v1381_v42  ;;  %v1495_v42 = vld [vmem:[%s2159_s11 + $0xf8] sm:$0xff] }
 0x280   : > { %v1510_v58 = vadd.f32 %v1478_v54, %v1376_v55  ;;  %v1992_v59 = vpop.f32.mrb[40].mxu1  ;;  %v1494_v55 = vld [vmem:[%s2159_s11 + $0xf0] sm:$0xff] }
 0x281   : > { %1544 = vst.msk [vmem:[%s2164_s14 + $0x78] sm:$0xff] %vm1528_vm7, %v1511_v56  ;;  %v1391_v62 = vadd.f32 %v1992_v59, %v2523_v57  ;;  %v1385_v63 = vpop.f32.mrb[41].mxu1 }
 0x282   : > { %1543 = vst.msk [vmem:[%s2164_s14 + $0x70] sm:$0xff] %vm1528_vm7, %v1510_v58  ;;  %v1386_v1 = vadd.f32 %v2523_v57, %v1385_v63 }
 0x283   : > { %v1513_v2 = vadd.f32 %v1481_v60, %v1391_v62 }
 0x284   : > { %v1512_v3 = vadd.f32 %v1480_v0, %v1386_v1  ;;  %v1995_v4 = vpop.f32.mrb[42].mxu1 }
 0x285   : > { %1546 = vst.msk [vmem:[%s2164_s14 + $0x88] sm:$0xff] %vm1528_vm7, %v1513_v2  ;;  %v1401_v61 = vadd.f32 %v1995_v4, %v2523_v57  ;;  %v1395_v6 = vpop.f32.mrb[43].mxu1 }
 0x286   : > { %1545 = vst.msk [vmem:[%s2164_s14 + $0x80] sm:$0xff] %vm1528_vm7, %v1512_v3  ;;  %v1396_v8 = vadd.f32 %v2523_v57, %v1395_v6 }
 0x287   : > { %v1515_v10 = vadd.f32 %v1483_v5, %v1401_v61 }
 0x288   : > { %v1514_v11 = vadd.f32 %v1482_v7, %v1396_v8  ;;  %v1998_v13 = vpop.f32.mrb[44].mxu1 }
 0x289   : > { %1548 = vst.msk [vmem:[%s2164_s14 + $0x98] sm:$0xff] %vm1528_vm7, %v1515_v10  ;;  %v1411_v14 = vadd.f32 %v1998_v13, %v2523_v57  ;;  %v1405_v15 = vpop.f32.mrb[45].mxu1 }
 0x28a   : > { %1547 = vst.msk [vmem:[%s2164_s14 + $0x90] sm:$0xff] %vm1528_vm7, %v1514_v11  ;;  %v1406_v17 = vadd.f32 %v2523_v57, %v1405_v15 }
 0x28b   : > { %v1517_v18 = vadd.f32 %v1485_v12, %v1411_v14 }
 0x28c   : > { %v1516_v20 = vadd.f32 %v1484_v16, %v1406_v17  ;;  %v2001_v9 = vpop.f32.mrb[46].mxu1 }
 0x28d   : > { %1550 = vst.msk [vmem:[%s2164_s14 + $0xa8] sm:$0xff] %vm1528_vm7, %v1517_v18  ;;  %v1421_v21 = vadd.f32 %v2001_v9, %v2523_v57  ;;  %v1415_v22 = vpop.f32.mrb[47].mxu1 }
 0x28e   : > { %1549 = vst.msk [vmem:[%s2164_s14 + $0xa0] sm:$0xff] %vm1528_vm7, %v1516_v20  ;;  %v1416_v24 = vadd.f32 %v2523_v57, %v1415_v22 }
 0x28f   : > { %v1519_v25 = vadd.f32 %v1487_v19, %v1421_v21 }
 0x290   : > { %v1518_v26 = vadd.f32 %v1486_v23, %v1416_v24  ;;  %v2004_v27 = vpop.f32.mrb[48].mxu1 }
 0x291   : > { %1552 = vst.msk [vmem:[%s2164_s14 + $0xb8] sm:$0xff] %vm1528_vm7, %v1519_v25  ;;  %v1431_v44 = vadd.f32 %v2004_v27, %v2523_v57  ;;  %v1425_v45 = vpop.f32.mrb[49].mxu1 }
 0x292   : > { %1551 = vst.msk [vmem:[%s2164_s14 + $0xb0] sm:$0xff] %vm1528_vm7, %v1518_v26  ;;  %v1426_v47 = vadd.f32 %v2523_v57, %v1425_v45 }
 0x293   : > { %v1521_v48 = vadd.f32 %v1489_v43, %v1431_v44 }
 0x294   : > { %v1520_v49 = vadd.f32 %v1488_v46, %v1426_v47  ;;  %v2007_v50 = vpop.f32.mrb[50].mxu1 }
 0x295   : > { %1554 = vst.msk [vmem:[%s2164_s14 + $0xc8] sm:$0xff] %vm1528_vm7, %v1521_v48  ;;  %v1441_v52 = vadd.f32 %v2007_v50, %v2523_v57  ;;  %v1435_v28 = vpop.f32.mrb[51].mxu1 }
 0x296   : > { %1553 = vst.msk [vmem:[%s2164_s14 + $0xc0] sm:$0xff] %vm1528_vm7, %v1520_v49  ;;  %v1436_v30 = vadd.f32 %v2523_v57, %v1435_v28 }
 0x297   : > { %v1523_v31 = vadd.f32 %v1491_v51, %v1441_v52 }
 0x298   : > { %v1522_v32 = vadd.f32 %v1490_v29, %v1436_v30  ;;  %v2010_v33 = vpop.f32.mrb[52].mxu1 }
 0x299   : > { %1556 = vst.msk [vmem:[%s2164_s14 + $0xd8] sm:$0xff] %vm1528_vm7, %v1523_v31  ;;  %v1451_v35 = vadd.f32 %v2010_v33, %v2523_v57  ;;  %v1445_v36 = vpop.f32.mrb[53].mxu1 }
 0x29a   : > { %1555 = vst.msk [vmem:[%s2164_s14 + $0xd0] sm:$0xff] %vm1528_vm7, %v1522_v32  ;;  %v1446_v38 = vadd.f32 %v2523_v57, %v1445_v36 }
 0x29b   : > { %v1525_v39 = vadd.f32 %v1493_v34, %v1451_v35 }
 0x29c   : > { %v1524_v40 = vadd.f32 %v1492_v37, %v1446_v38  ;;  %v2013_v41 = vpop.f32.mrb[54].mxu1 }
 0x29d   : > { %1558 = vst.msk [vmem:[%s2164_s14 + $0xe8] sm:$0xff] %vm1528_vm7, %v1525_v39  ;;  %v1461_v53 = vadd.f32 %v2013_v41, %v2523_v57  ;;  %v1455_v54 = vpop.f32.mrb[55].mxu1 }
 0x29e   : > { %1557 = vst.msk [vmem:[%s2164_s14 + $0xe0] sm:$0xff] %vm1528_vm7, %v1524_v40  ;;  %v1456_v56 = vadd.f32 %v2523_v57, %v1455_v54 }
 0x29f   : > { %v1527_v58 = vadd.f32 %v1495_v42, %v1461_v53 }
 0x2a0   : > { %v1526_v59 = vadd.f32 %v1494_v55, %v1456_v56 }
 0x2a1   : > { %1560 = vst.msk [vmem:[%s2164_s14 + $0xf8] sm:$0xff] %vm1528_vm7, %v1527_v58 }
 0x2a2   : > { %1559 = vst.msk [vmem:[%s2164_s14 + $0xf0] sm:$0xff] %vm1528_vm7, %v1526_v59 }
 0x2a3 PF: > { %s17_s26 = sadd.s32 1, %s2081_s26   ;;  %s2670_s24 = smov %s2077_s25 }
 0x2a4   : > { %p14_p6 = scmp.ge.s32.totalorder %s17_s26, 4   ;;  %s2671_s25 = smov %s2673_s27 }
 0x2a6   :  { %16 = sbr.rel (!%p14_p6) target bundleno = 2 (0x2), region = 103 }

</bundles_post_ra>
